<compile_context>
chip_gen: v6e
topology: v6e:2x2x1
jax: 0.10.0
libtpu: 0.0.40
codegen_flags: <defaults>
</compile_context>

<pallas_src>
import math
import jax
import jax.numpy as jnp
from jax import lax
from jax.experimental import pallas as pl
from jax.experimental.pallas import tpu as pltpu

BN_EPS = 1e-5          # PyTorch BatchNorm1d default
NORM_EPS = 1e-12       # F.normalize default
MAXC = 128             # lane-padded width of the packed weight slab


def _ceil_to(n, m):
    return ((n + m - 1) // m) * m


# ---------------------------------------------------------------------------
# Fused kernel (built per static layer configuration)
# ---------------------------------------------------------------------------
def make_gtf_kernel(meta, B, L, feat):
    """meta: per-res-block dict with static offsets/sizes into wcat/pcat."""
    N = B * L

    def kernel(x_ref, w_ref, p_ref, o_ref):
        # x_ref : (cin_pad0, N) f32   input as a channel-padded lane-dense slab
        # w_ref : (R, MAXC)     bf16  packed im2col weights (16-aligned rows)
        # p_ref : (R, 2)        f32   col0 = gamma, col1 = beta
        # o_ref : (feat, B)     f32   L2-normalized embedding (transposed)

        lidx_cache = {}
        mask_cache = {}

        def l_idx(rows):
            if rows not in lidx_cache:
                one = lax.broadcasted_iota(jnp.int32, (rows, L), 1)
                lidx_cache[rows] = jnp.concatenate([one] * B, axis=1)  # (rows, N)
            return lidx_cache[rows]

        def maskf(d, rows):
            # 'same'-padding boundary mask, hoisted/broadened to full sublane
            # height once per (shift, rows) and reused as a multiplicative mask.
            key = (d, rows)
            if key not in mask_cache:
                li = l_idx(rows)
                mask_cache[key] = ((li + d >= 0) & (li + d < L)).astype(jnp.float32)
            return mask_cache[key]

        def im2col_bf16(h, K):
            """h: (cin_pad, N) f32 -> (K*cin_pad, N) bf16 via static lane rolls."""
            rows = h.shape[0]
            p = K // 2
            taps = []
            for t in range(K):
                d = t - p
                if d == 0:
                    taps.append(h)
                else:
                    rolled = pltpu.roll(h, shift=(-d) % N, axis=1)
                    taps.append(rolled * maskf(d, rows))
            # every tap chunk is a multiple of 8 sublanes -> aligned concat
            return jnp.concatenate(taps, axis=0).astype(jnp.bfloat16)

        inv_n = 1.0 / N

        def conv_bn_relu(xcol, off, rows, cols):
            # Static, tile-aligned slices out of the packed parameter slabs.
            w = w_ref[off:off + rows, 0:cols]          # (rows, cols) bf16
            gamma = p_ref[off:off + rows, 0:1]         # (rows, 1) f32
            beta = p_ref[off:off + rows, 1:2]          # (rows, 1) f32

            # One bf16 MXU matmul over the whole batch (f32 accumulation).
            acc = jnp.dot(w, xcol, preferred_element_type=jnp.float32)   # (rows, N)

            # BatchNorm1d training-mode batch stats: ONE cross-lane reduction
            # over [acc; acc*acc] stacked on sublanes (rows are 8-aligned).
            stats = jnp.sum(jnp.concatenate([acc, acc * acc], axis=0),
                            axis=1, keepdims=True) * inv_n               # (2*rows, 1)
            mean = stats[:rows]
            var = jnp.maximum(stats[rows:] - mean * mean, 0.0)
            scale = gamma * lax.rsqrt(var + BN_EPS)
            shift = beta - mean * scale
            return jnp.maximum(acc * scale + shift, 0.0)                 # fused BN+ReLU

        h = x_ref[...]                                 # (cin_pad0, N) f32
        for m in meta:
            # Shared im2col for conv1 + shortcut; both done in ONE fused matmul.
            xc = im2col_bf16(h, m['k'])
            yA = conv_bn_relu(xc, m['offA'], m['rowsA'], m['cols'])
            h1 = yA[:m['cmid_pad']]                    # conv1 output
            sc = yA[m['cmid_pad']:]                    # shortcut output
            xc2 = im2col_bf16(h1, m['k'])
            h2 = conv_bn_relu(xc2, m['offB'], m['rowsB'], m['cols'])     # conv2
            h = h2 + sc                                # residual add, stays in VMEM

        # AdaptiveAvgPool1d(1): lane-aligned per-batch slice reductions
        # (L = 128 = exactly one lane tile); no pool-matrix operand.
        pooled = jnp.concatenate(
            [jnp.sum(h[:, b * L:(b + 1) * L], axis=1, keepdims=True) for b in range(B)],
            axis=1) * (1.0 / L)                        # (cout_pad, B)
        pooled = pooled[:feat, :]                      # real feature rows
        # F.normalize(dim=1) over the feature axis (axis 0 here).
        nrm = jnp.sqrt(jnp.sum(pooled * pooled, axis=0, keepdims=True))
        o_ref[...] = (pooled / jnp.maximum(nrm, NORM_EPS)).astype(o_ref.dtype)

    return kernel


# ---------------------------------------------------------------------------
# Parameter packing: 12 conv layers -> one bf16 weight slab + one f32 BN slab
# ---------------------------------------------------------------------------
def pack_gtf_params(params):
    w_chunks, g_chunks, b_chunks, meta = [], [], [], []
    row_off = 0

    for blk in params['blocks']:
        w1, g1, b1, k = blk['conv1']
        w2, g2, b2, _ = blk['conv2']
        ws, gs, bs, _ = blk['shortcut']
        assert k % 2 == 1, "im2col path assumes odd ('same') kernel size"

        cin = w1.shape[1]
        cmid = w1.shape[0]                 # conv1 is Cin -> Cin
        cout = w2.shape[0]
        cin_pad = _ceil_to(cin, 8)
        cmid_pad = _ceil_to(cmid, 8)
        cout_pad = _ceil_to(cout, 8)
        cols = k * cin_pad
        assert cols <= MAXC

        def w_im2col(w, rows_pad):
            # w: (co, ci, k) -> (rows_pad, k*cin_pad) with
            # out[o, t*cin_pad + c] == w[o, c, t]; pad channels are zero.
            co, ci, kk = w.shape
            wt = jnp.transpose(w, (0, 2, 1))                         # (co, k, ci)
            wt = jnp.pad(wt, ((0, rows_pad - co), (0, 0), (0, cin_pad - ci)))
            return wt.reshape(rows_pad, kk * cin_pad)

        def vpad(v, rows_pad):
            return jnp.pad(v, (0, rows_pad - v.shape[0]))            # pads with 0

        def add_unit(wmat, g, b):
            nonlocal row_off
            rows = wmat.shape[0]
            span = _ceil_to(rows, 16)      # 16-aligned offsets for bf16 tiling
            w_chunks.append(jnp.pad(wmat, ((0, span - rows), (0, MAXC - wmat.shape[1]))))
            g_chunks.append(vpad(g, span))
            b_chunks.append(vpad(b, span))
            off = row_off
            row_off += span
            return off, rows

        # Unit A: conv1 (+) shortcut fused along Cout (padded gamma/beta are 0,
        # so padded channels come out exactly 0 after BN + ReLU).
        wA = jnp.concatenate([w_im2col(w1, cmid_pad), w_im2col(ws, cout_pad)], axis=0)
        gA = jnp.concatenate([vpad(g1, cmid_pad), vpad(gs, cout_pad)])
        bA = jnp.concatenate([vpad(b1, cmid_pad), vpad(bs, cout_pad)])
        offA, rowsA = add_unit(wA, gA, bA)
        # Unit B: conv2.
        offB, rowsB = add_unit(w_im2col(w2, cout_pad), vpad(g2, cout_pad), vpad(b2, cout_pad))

        meta.append(dict(k=k, cin_pad=cin_pad, cmid_pad=cmid_pad, cout_pad=cout_pad,
                         cols=cols, offA=offA, rowsA=rowsA, offB=offB, rowsB=rowsB))

    wcat = jnp.concatenate(w_chunks, axis=0).astype(jnp.bfloat16)     # (R, MAXC)
    pcat = jnp.stack([jnp.concatenate(g_chunks),
                      jnp.concatenate(b_chunks)], axis=1).astype(jnp.float32)  # (R, 2)
    feat = params['blocks'][-1]['conv2'][0].shape[0]
    return wcat, pcat, meta, feat


# ---------------------------------------------------------------------------
# Wrapper
# ---------------------------------------------------------------------------
def gtf_forward(x, params):
    B = x.shape[0]
    xf = x.reshape(B, -1).astype(jnp.float32)        # x.view(B, 1, -1): Cin = 1
    L = xf.shape[1]
    N = B * L

    wcat, pcat, meta, feat = pack_gtf_params(params)

    # Input as a channel-padded, lane-dense (cin_pad, B*L) slab (row 0 = data).
    cin_pad0 = meta[0]['cin_pad']
    x_pad = jnp.zeros((cin_pad0, N), jnp.float32).at[0, :].set(xf.reshape(N))

    flops = int(sum(2 * (m['rowsA'] + m['rowsB']) * m['cols'] * N for m in meta)
                + 2 * feat * N)
    transcendentals = int(sum(m['rowsA'] + m['rowsB'] for m in meta) + B)
    bytes_accessed = int(x_pad.size * 4 + wcat.size * 2 + pcat.size * 4 + feat * B * 4)

    kernel = make_gtf_kernel(meta, B, L, feat)
    emb_t = pl.pallas_call(
        kernel,
        out_shape=jax.ShapeDtypeStruct((feat, B), jnp.float32),
        in_specs=[pl.BlockSpec(memory_space=pltpu.MemorySpace.VMEM)] * 3,
        out_specs=pl.BlockSpec(memory_space=pltpu.MemorySpace.VMEM),
        cost_estimate=pl.CostEstimate(flops=flops,
                                      transcendentals=transcendentals,
                                      bytes_accessed=bytes_accessed),
    )(x_pad, wcat, pcat)

    # (feat, B) -> (B, feat). Kept on the host: a tiny array, and an in-kernel
    # sublane<->lane transpose is not worth the lowering risk at this size.
    return emb_t.T


# ---------------------------------------------------------------------------
# Deterministic parameter init (matches module __init__ shapes / inits).
# Conv bias is omitted: under training-mode BatchNorm it cancels exactly.
# ---------------------------------------------------------------------------
def init_conv_bn(key, cin, cout, k):
    fan_in, fan_out = cin * k, cout * k
    std = math.sqrt(2.0 / (fan_in + fan_out))                 # xavier_normal_
    w = std * jax.random.normal(key, (cout, cin, k), jnp.float32)
    gamma = jnp.ones((cout,), jnp.float32)                    # BN weight = 1
    beta = jnp.zeros((cout,), jnp.float32)                    # BN bias = 0
    return (w, gamma, beta, k)


def init_res_block(key, cin, cout, k):
    k1, k2, k3 = jax.random.split(key, 3)
    return {
        'conv1': init_conv_bn(k1, cin, cin, k),
        'conv2': init_conv_bn(k2, cin, cout, k),
        'shortcut': init_conv_bn(k3, cin, cout, k),
    }


# ---------------------------------------------------------------------------
if __name__ == "__main__":
    config = {'model_params': {'feature': 16, 'l1': 4, 'l2': 8, 'l3': 8, 'kernel': 3}}
    mp = config['model_params']

    key = jax.random.PRNGKey(0)
    kx, kp = jax.random.split(key)
    kb1, kb2, kb3, kb4 = jax.random.split(kp, 4)

    params = {'blocks': [
        init_res_block(kb1, 1, mp['l1'], 5),                         # block1 (kernel=5)
        init_res_block(kb2, mp['l1'], mp['l2'], mp['kernel']),       # block2
        init_res_block(kb3, mp['l2'], mp['l3'], mp['kernel']),       # block3
        init_res_block(kb4, mp['l3'], mp['feature'], mp['kernel']),  # block4
    ]}

    # Input: (B, L); the module's forward views it as (B, 1, L).
    x = jax.random.normal(kx, (2, 128), jnp.float32)

    out = gtf_forward(x, params)
    jax.block_until_ready(out)
    assert out.shape == (2, mp['feature'])
    assert bool(jnp.all(jnp.isfinite(out)))
    # Rows are L2-normalized embeddings.
    assert bool(jnp.allclose(jnp.sum(out * out, axis=1), 1.0, atol=1e-3))
    print("KERNEL_OK")
</pallas_src>

<mosaic_0001>
module attributes {stable_mosaic.version = 11 : i64} {
  func.func @kernel(%arg0: memref<8x256xf32, #tpu.memory_space<vmem>>, %arg1: memref<144x128xbf16, #tpu.memory_space<vmem>>, %arg2: memref<144x2xf32, #tpu.memory_space<vmem>>, %arg3: memref<16x2xf32, #tpu.memory_space<vmem>>) attributes {dimension_semantics = [], scalar_prefetch = 0 : i64, scratch_operands = 0 : i64, tpu.core_type = #tpu.core_type<tc>} {
    %c0 = arith.constant 0 : index
    %c0_0 = arith.constant 0 : index
    %0 = vector.load %arg0[%c0, %c0_0] : memref<8x256xf32, #tpu.memory_space<vmem>>, vector<8x256xf32>
    %c2_i32 = arith.constant 2 : i32
    %1 = tpu.dynamic_rotate %0 by %c2_i32 dim 1 : vector<8x256xf32>, i32 -> vector<8x256xf32>
    %2 = tpu.iota {dimensions = array<i32: 1>} : vector<8x128xi32>
    %3 = tpu.concatenate %2, %2 in 1 : vector<8x128xi32>, vector<8x128xi32> -> vector<8x256xi32>
    %c-2_i32 = arith.constant -2 : i32
    %4 = vector.broadcast %c-2_i32 : i32 to vector<8x256xi32>
    %5 = arith.addi %3, %4 : vector<8x256xi32>
    %c0_i32 = arith.constant 0 : i32
    %6 = vector.broadcast %c0_i32 : i32 to vector<8x256xi32>
    %7 = arith.cmpi sge, %5, %6 : vector<8x256xi32>
    %c-2_i32_1 = arith.constant -2 : i32
    %8 = vector.broadcast %c-2_i32_1 : i32 to vector<8x256xi32>
    %9 = arith.addi %3, %8 : vector<8x256xi32>
    %c128_i32 = arith.constant 128 : i32
    %10 = vector.broadcast %c128_i32 : i32 to vector<8x256xi32>
    %11 = arith.cmpi slt, %9, %10 : vector<8x256xi32>
    %12 = arith.andi %7, %11 : vector<8x256xi1>
    %13 = arith.extui %12 : vector<8x256xi1> to vector<8x256xi32>
    %14 = arith.sitofp %13 : vector<8x256xi32> to vector<8x256xf32>
    %15 = arith.mulf %1, %14 : vector<8x256xf32>
    %c1_i32 = arith.constant 1 : i32
    %16 = tpu.dynamic_rotate %0 by %c1_i32 dim 1 : vector<8x256xf32>, i32 -> vector<8x256xf32>
    %c-1_i32 = arith.constant -1 : i32
    %17 = vector.broadcast %c-1_i32 : i32 to vector<8x256xi32>
    %18 = arith.addi %3, %17 : vector<8x256xi32>
    %c0_i32_2 = arith.constant 0 : i32
    %19 = vector.broadcast %c0_i32_2 : i32 to vector<8x256xi32>
    %20 = arith.cmpi sge, %18, %19 : vector<8x256xi32>
    %c-1_i32_3 = arith.constant -1 : i32
    %21 = vector.broadcast %c-1_i32_3 : i32 to vector<8x256xi32>
    %22 = arith.addi %3, %21 : vector<8x256xi32>
    %c128_i32_4 = arith.constant 128 : i32
    %23 = vector.broadcast %c128_i32_4 : i32 to vector<8x256xi32>
    %24 = arith.cmpi slt, %22, %23 : vector<8x256xi32>
    %25 = arith.andi %20, %24 : vector<8x256xi1>
    %26 = arith.extui %25 : vector<8x256xi1> to vector<8x256xi32>
    %27 = arith.sitofp %26 : vector<8x256xi32> to vector<8x256xf32>
    %28 = arith.mulf %16, %27 : vector<8x256xf32>
    %c255_i32 = arith.constant 255 : i32
    %29 = tpu.dynamic_rotate %0 by %c255_i32 dim 1 : vector<8x256xf32>, i32 -> vector<8x256xf32>
    %c1_i32_5 = arith.constant 1 : i32
    %30 = vector.broadcast %c1_i32_5 : i32 to vector<8x256xi32>
    %31 = arith.addi %3, %30 : vector<8x256xi32>
    %c0_i32_6 = arith.constant 0 : i32
    %32 = vector.broadcast %c0_i32_6 : i32 to vector<8x256xi32>
    %33 = arith.cmpi sge, %31, %32 : vector<8x256xi32>
    %c1_i32_7 = arith.constant 1 : i32
    %34 = vector.broadcast %c1_i32_7 : i32 to vector<8x256xi32>
    %35 = arith.addi %3, %34 : vector<8x256xi32>
    %c128_i32_8 = arith.constant 128 : i32
    %36 = vector.broadcast %c128_i32_8 : i32 to vector<8x256xi32>
    %37 = arith.cmpi slt, %35, %36 : vector<8x256xi32>
    %38 = arith.andi %33, %37 : vector<8x256xi1>
    %39 = arith.extui %38 : vector<8x256xi1> to vector<8x256xi32>
    %40 = arith.sitofp %39 : vector<8x256xi32> to vector<8x256xf32>
    %41 = arith.mulf %29, %40 : vector<8x256xf32>
    %c254_i32 = arith.constant 254 : i32
    %42 = tpu.dynamic_rotate %0 by %c254_i32 dim 1 : vector<8x256xf32>, i32 -> vector<8x256xf32>
    %c2_i32_9 = arith.constant 2 : i32
    %43 = vector.broadcast %c2_i32_9 : i32 to vector<8x256xi32>
    %44 = arith.addi %3, %43 : vector<8x256xi32>
    %c0_i32_10 = arith.constant 0 : i32
    %45 = vector.broadcast %c0_i32_10 : i32 to vector<8x256xi32>
    %46 = arith.cmpi sge, %44, %45 : vector<8x256xi32>
    %c2_i32_11 = arith.constant 2 : i32
    %47 = vector.broadcast %c2_i32_11 : i32 to vector<8x256xi32>
    %48 = arith.addi %3, %47 : vector<8x256xi32>
    %c128_i32_12 = arith.constant 128 : i32
    %49 = vector.broadcast %c128_i32_12 : i32 to vector<8x256xi32>
    %50 = arith.cmpi slt, %48, %49 : vector<8x256xi32>
    %51 = arith.andi %46, %50 : vector<8x256xi1>
    %52 = arith.extui %51 : vector<8x256xi1> to vector<8x256xi32>
    %53 = arith.sitofp %52 : vector<8x256xi32> to vector<8x256xf32>
    %54 = arith.mulf %42, %53 : vector<8x256xf32>
    %55 = tpu.concatenate %15, %28, %0, %41, %54 in 0 : vector<8x256xf32>, vector<8x256xf32>, vector<8x256xf32>, vector<8x256xf32>, vector<8x256xf32> -> vector<40x256xf32>
    %56 = arith.truncf %55 : vector<40x256xf32> to vector<40x256xbf16>
    %c0_13 = arith.constant 0 : index
    %c0_14 = arith.constant 0 : index
    %57 = vector.load %arg1[%c0_13, %c0_14] : memref<144x128xbf16, #tpu.memory_space<vmem>>, vector<16x40xbf16>
    %c0_15 = arith.constant 0 : index
    %c0_16 = arith.constant 0 : index
    %58 = vector.load %arg2[%c0_15, %c0_16] : memref<144x2xf32, #tpu.memory_space<vmem>>, vector<16x1xf32>
    %c0_17 = arith.constant 0 : index
    %c1 = arith.constant 1 : index
    %59 = vector.load %arg2[%c0_17, %c1] : memref<144x2xf32, #tpu.memory_space<vmem>>, vector<16x1xf32>
    %cst = arith.constant dense<0.000000e+00> : vector<16x256xf32>
    %60 = tpu.matmul %57, %56, %cst {dimension_numbers = #tpu.dot_dimension_numbers<[1], [0], [0], [1], [0, 0, 1, 1], [], []>} : vector<16x40xbf16>, vector<40x256xbf16>, vector<16x256xf32> -> vector<16x256xf32>
    %61 = arith.mulf %60, %60 : vector<16x256xf32>
    %62 = tpu.concatenate %60, %61 in 0 : vector<16x256xf32>, vector<16x256xf32> -> vector<32x256xf32>
    %cst_18 = arith.constant dense<0.000000e+00> : vector<32xf32>
    %63 = vector.multi_reduction <add>, %62, %cst_18 [1] : vector<32x256xf32> to vector<32xf32>
    %64 = vector.shape_cast %63 : vector<32xf32> to vector<32x1xf32>
    %cst_19 = arith.constant 3.906250e-03 : f32
    %65 = vector.broadcast %cst_19 : f32 to vector<32x1xf32>
    %66 = arith.mulf %64, %65 : vector<32x1xf32>
    %67 = vector.extract_strided_slice %66 {offsets = [0, 0], sizes = [16, 1], strides = [1, 1]} : vector<32x1xf32> to vector<16x1xf32>
    %68 = vector.extract_strided_slice %66 {offsets = [16, 0], sizes = [16, 1], strides = [1, 1]} : vector<32x1xf32> to vector<16x1xf32>
    %69 = arith.mulf %67, %67 : vector<16x1xf32>
    %70 = arith.subf %68, %69 : vector<16x1xf32>
    %cst_20 = arith.constant 0.000000e+00 : f32
    %71 = vector.broadcast %cst_20 : f32 to vector<16x1xf32>
    %72 = arith.maximumf %70, %71 : vector<16x1xf32>
    %cst_21 = arith.constant 9.99999974E-6 : f32
    %73 = vector.broadcast %cst_21 : f32 to vector<16x1xf32>
    %74 = arith.addf %72, %73 : vector<16x1xf32>
    %75 = math.rsqrt %74 : vector<16x1xf32>
    %76 = arith.mulf %58, %75 : vector<16x1xf32>
    %77 = arith.mulf %67, %76 : vector<16x1xf32>
    %78 = arith.subf %59, %77 : vector<16x1xf32>
    %79 = vector.broadcast %76 : vector<16x1xf32> to vector<16x256xf32>
    %80 = arith.mulf %60, %79 : vector<16x256xf32>
    %81 = vector.broadcast %78 : vector<16x1xf32> to vector<16x256xf32>
    %82 = arith.addf %80, %81 : vector<16x256xf32>
    %cst_22 = arith.constant 0.000000e+00 : f32
    %83 = vector.broadcast %cst_22 : f32 to vector<16x256xf32>
    %84 = arith.maximumf %82, %83 : vector<16x256xf32>
    %85 = vector.extract_strided_slice %84 {offsets = [0, 0], sizes = [8, 256], strides = [1, 1]} : vector<16x256xf32> to vector<8x256xf32>
    %86 = vector.extract_strided_slice %84 {offsets = [8, 0], sizes = [8, 256], strides = [1, 1]} : vector<16x256xf32> to vector<8x256xf32>
    %c2_i32_23 = arith.constant 2 : i32
    %87 = tpu.dynamic_rotate %85 by %c2_i32_23 dim 1 : vector<8x256xf32>, i32 -> vector<8x256xf32>
    %88 = arith.mulf %87, %14 : vector<8x256xf32>
    %c1_i32_24 = arith.constant 1 : i32
    %89 = tpu.dynamic_rotate %85 by %c1_i32_24 dim 1 : vector<8x256xf32>, i32 -> vector<8x256xf32>
    %90 = arith.mulf %89, %27 : vector<8x256xf32>
    %c255_i32_25 = arith.constant 255 : i32
    %91 = tpu.dynamic_rotate %85 by %c255_i32_25 dim 1 : vector<8x256xf32>, i32 -> vector<8x256xf32>
    %92 = arith.mulf %91, %40 : vector<8x256xf32>
    %c254_i32_26 = arith.constant 254 : i32
    %93 = tpu.dynamic_rotate %85 by %c254_i32_26 dim 1 : vector<8x256xf32>, i32 -> vector<8x256xf32>
    %94 = arith.mulf %93, %53 : vector<8x256xf32>
    %95 = tpu.concatenate %88, %90, %85, %92, %94 in 0 : vector<8x256xf32>, vector<8x256xf32>, vector<8x256xf32>, vector<8x256xf32>, vector<8x256xf32> -> vector<40x256xf32>
    %96 = arith.truncf %95 : vector<40x256xf32> to vector<40x256xbf16>
    %c16 = arith.constant 16 : index
    %c0_27 = arith.constant 0 : index
    %97 = vector.load %arg1[%c16, %c0_27] : memref<144x128xbf16, #tpu.memory_space<vmem>>, vector<8x40xbf16>
    %c16_28 = arith.constant 16 : index
    %c0_29 = arith.constant 0 : index
    %98 = vector.load %arg2[%c16_28, %c0_29] : memref<144x2xf32, #tpu.memory_space<vmem>>, vector<8x1xf32>
    %c16_30 = arith.constant 16 : index
    %c1_31 = arith.constant 1 : index
    %99 = vector.load %arg2[%c16_30, %c1_31] : memref<144x2xf32, #tpu.memory_space<vmem>>, vector<8x1xf32>
    %cst_32 = arith.constant dense<0.000000e+00> : vector<8x256xf32>
    %100 = tpu.matmul %97, %96, %cst_32 {dimension_numbers = #tpu.dot_dimension_numbers<[1], [0], [0], [1], [0, 0, 1, 1], [], []>} : vector<8x40xbf16>, vector<40x256xbf16>, vector<8x256xf32> -> vector<8x256xf32>
    %101 = arith.mulf %100, %100 : vector<8x256xf32>
    %102 = tpu.concatenate %100, %101 in 0 : vector<8x256xf32>, vector<8x256xf32> -> vector<16x256xf32>
    %cst_33 = arith.constant dense<0.000000e+00> : vector<16xf32>
    %103 = vector.multi_reduction <add>, %102, %cst_33 [1] : vector<16x256xf32> to vector<16xf32>
    %104 = vector.shape_cast %103 : vector<16xf32> to vector<16x1xf32>
    %cst_34 = arith.constant 3.906250e-03 : f32
    %105 = vector.broadcast %cst_34 : f32 to vector<16x1xf32>
    %106 = arith.mulf %104, %105 : vector<16x1xf32>
    %107 = vector.extract_strided_slice %106 {offsets = [0, 0], sizes = [8, 1], strides = [1, 1]} : vector<16x1xf32> to vector<8x1xf32>
    %108 = vector.extract_strided_slice %106 {offsets = [8, 0], sizes = [8, 1], strides = [1, 1]} : vector<16x1xf32> to vector<8x1xf32>
    %109 = arith.mulf %107, %107 : vector<8x1xf32>
    %110 = arith.subf %108, %109 : vector<8x1xf32>
    %cst_35 = arith.constant 0.000000e+00 : f32
    %111 = vector.broadcast %cst_35 : f32 to vector<8x1xf32>
    %112 = arith.maximumf %110, %111 : vector<8x1xf32>
    %cst_36 = arith.constant 9.99999974E-6 : f32
    %113 = vector.broadcast %cst_36 : f32 to vector<8x1xf32>
    %114 = arith.addf %112, %113 : vector<8x1xf32>
    %115 = math.rsqrt %114 : vector<8x1xf32>
    %116 = arith.mulf %98, %115 : vector<8x1xf32>
    %117 = arith.mulf %107, %116 : vector<8x1xf32>
    %118 = arith.subf %99, %117 : vector<8x1xf32>
    %119 = vector.broadcast %116 : vector<8x1xf32> to vector<8x256xf32>
    %120 = arith.mulf %100, %119 : vector<8x256xf32>
    %121 = vector.broadcast %118 : vector<8x1xf32> to vector<8x256xf32>
    %122 = arith.addf %120, %121 : vector<8x256xf32>
    %cst_37 = arith.constant 0.000000e+00 : f32
    %123 = vector.broadcast %cst_37 : f32 to vector<8x256xf32>
    %124 = arith.maximumf %122, %123 : vector<8x256xf32>
    %125 = arith.addf %124, %86 : vector<8x256xf32>
    %c1_i32_38 = arith.constant 1 : i32
    %126 = tpu.dynamic_rotate %125 by %c1_i32_38 dim 1 : vector<8x256xf32>, i32 -> vector<8x256xf32>
    %127 = arith.mulf %126, %27 : vector<8x256xf32>
    %c255_i32_39 = arith.constant 255 : i32
    %128 = tpu.dynamic_rotate %125 by %c255_i32_39 dim 1 : vector<8x256xf32>, i32 -> vector<8x256xf32>
    %129 = arith.mulf %128, %40 : vector<8x256xf32>
    %130 = tpu.concatenate %127, %125, %129 in 0 : vector<8x256xf32>, vector<8x256xf32>, vector<8x256xf32> -> vector<24x256xf32>
    %131 = arith.truncf %130 : vector<24x256xf32> to vector<24x256xbf16>
    %c32 = arith.constant 32 : index
    %c0_40 = arith.constant 0 : index
    %132 = vector.load %arg1[%c32, %c0_40] : memref<144x128xbf16, #tpu.memory_space<vmem>>, vector<16x24xbf16>
    %c32_41 = arith.constant 32 : index
    %c0_42 = arith.constant 0 : index
    %133 = vector.load %arg2[%c32_41, %c0_42] : memref<144x2xf32, #tpu.memory_space<vmem>>, vector<16x1xf32>
    %c32_43 = arith.constant 32 : index
    %c1_44 = arith.constant 1 : index
    %134 = vector.load %arg2[%c32_43, %c1_44] : memref<144x2xf32, #tpu.memory_space<vmem>>, vector<16x1xf32>
    %cst_45 = arith.constant dense<0.000000e+00> : vector<16x256xf32>
    %135 = tpu.matmul %132, %131, %cst_45 {dimension_numbers = #tpu.dot_dimension_numbers<[1], [0], [0], [1], [0, 0, 1, 1], [], []>} : vector<16x24xbf16>, vector<24x256xbf16>, vector<16x256xf32> -> vector<16x256xf32>
    %136 = arith.mulf %135, %135 : vector<16x256xf32>
    %137 = tpu.concatenate %135, %136 in 0 : vector<16x256xf32>, vector<16x256xf32> -> vector<32x256xf32>
    %cst_46 = arith.constant dense<0.000000e+00> : vector<32xf32>
    %138 = vector.multi_reduction <add>, %137, %cst_46 [1] : vector<32x256xf32> to vector<32xf32>
    %139 = vector.shape_cast %138 : vector<32xf32> to vector<32x1xf32>
    %cst_47 = arith.constant 3.906250e-03 : f32
    %140 = vector.broadcast %cst_47 : f32 to vector<32x1xf32>
    %141 = arith.mulf %139, %140 : vector<32x1xf32>
    %142 = vector.extract_strided_slice %141 {offsets = [0, 0], sizes = [16, 1], strides = [1, 1]} : vector<32x1xf32> to vector<16x1xf32>
    %143 = vector.extract_strided_slice %141 {offsets = [16, 0], sizes = [16, 1], strides = [1, 1]} : vector<32x1xf32> to vector<16x1xf32>
    %144 = arith.mulf %142, %142 : vector<16x1xf32>
    %145 = arith.subf %143, %144 : vector<16x1xf32>
    %cst_48 = arith.constant 0.000000e+00 : f32
    %146 = vector.broadcast %cst_48 : f32 to vector<16x1xf32>
    %147 = arith.maximumf %145, %146 : vector<16x1xf32>
    %cst_49 = arith.constant 9.99999974E-6 : f32
    %148 = vector.broadcast %cst_49 : f32 to vector<16x1xf32>
    %149 = arith.addf %147, %148 : vector<16x1xf32>
    %150 = math.rsqrt %149 : vector<16x1xf32>
    %151 = arith.mulf %133, %150 : vector<16x1xf32>
    %152 = arith.mulf %142, %151 : vector<16x1xf32>
    %153 = arith.subf %134, %152 : vector<16x1xf32>
    %154 = vector.broadcast %151 : vector<16x1xf32> to vector<16x256xf32>
    %155 = arith.mulf %135, %154 : vector<16x256xf32>
    %156 = vector.broadcast %153 : vector<16x1xf32> to vector<16x256xf32>
    %157 = arith.addf %155, %156 : vector<16x256xf32>
    %cst_50 = arith.constant 0.000000e+00 : f32
    %158 = vector.broadcast %cst_50 : f32 to vector<16x256xf32>
    %159 = arith.maximumf %157, %158 : vector<16x256xf32>
    %160 = vector.extract_strided_slice %159 {offsets = [0, 0], sizes = [8, 256], strides = [1, 1]} : vector<16x256xf32> to vector<8x256xf32>
    %161 = vector.extract_strided_slice %159 {offsets = [8, 0], sizes = [8, 256], strides = [1, 1]} : vector<16x256xf32> to vector<8x256xf32>
    %c1_i32_51 = arith.constant 1 : i32
    %162 = tpu.dynamic_rotate %160 by %c1_i32_51 dim 1 : vector<8x256xf32>, i32 -> vector<8x256xf32>
    %163 = arith.mulf %162, %27 : vector<8x256xf32>
    %c255_i32_52 = arith.constant 255 : i32
    %164 = tpu.dynamic_rotate %160 by %c255_i32_52 dim 1 : vector<8x256xf32>, i32 -> vector<8x256xf32>
    %165 = arith.mulf %164, %40 : vector<8x256xf32>
    %166 = tpu.concatenate %163, %160, %165 in 0 : vector<8x256xf32>, vector<8x256xf32>, vector<8x256xf32> -> vector<24x256xf32>
    %167 = arith.truncf %166 : vector<24x256xf32> to vector<24x256xbf16>
    %c48 = arith.constant 48 : index
    %c0_53 = arith.constant 0 : index
    %168 = vector.load %arg1[%c48, %c0_53] : memref<144x128xbf16, #tpu.memory_space<vmem>>, vector<8x24xbf16>
    %c48_54 = arith.constant 48 : index
    %c0_55 = arith.constant 0 : index
    %169 = vector.load %arg2[%c48_54, %c0_55] : memref<144x2xf32, #tpu.memory_space<vmem>>, vector<8x1xf32>
    %c48_56 = arith.constant 48 : index
    %c1_57 = arith.constant 1 : index
    %170 = vector.load %arg2[%c48_56, %c1_57] : memref<144x2xf32, #tpu.memory_space<vmem>>, vector<8x1xf32>
    %cst_58 = arith.constant dense<0.000000e+00> : vector<8x256xf32>
    %171 = tpu.matmul %168, %167, %cst_58 {dimension_numbers = #tpu.dot_dimension_numbers<[1], [0], [0], [1], [0, 0, 1, 1], [], []>} : vector<8x24xbf16>, vector<24x256xbf16>, vector<8x256xf32> -> vector<8x256xf32>
    %172 = arith.mulf %171, %171 : vector<8x256xf32>
    %173 = tpu.concatenate %171, %172 in 0 : vector<8x256xf32>, vector<8x256xf32> -> vector<16x256xf32>
    %cst_59 = arith.constant dense<0.000000e+00> : vector<16xf32>
    %174 = vector.multi_reduction <add>, %173, %cst_59 [1] : vector<16x256xf32> to vector<16xf32>
    %175 = vector.shape_cast %174 : vector<16xf32> to vector<16x1xf32>
    %cst_60 = arith.constant 3.906250e-03 : f32
    %176 = vector.broadcast %cst_60 : f32 to vector<16x1xf32>
    %177 = arith.mulf %175, %176 : vector<16x1xf32>
    %178 = vector.extract_strided_slice %177 {offsets = [0, 0], sizes = [8, 1], strides = [1, 1]} : vector<16x1xf32> to vector<8x1xf32>
    %179 = vector.extract_strided_slice %177 {offsets = [8, 0], sizes = [8, 1], strides = [1, 1]} : vector<16x1xf32> to vector<8x1xf32>
    %180 = arith.mulf %178, %178 : vector<8x1xf32>
    %181 = arith.subf %179, %180 : vector<8x1xf32>
    %cst_61 = arith.constant 0.000000e+00 : f32
    %182 = vector.broadcast %cst_61 : f32 to vector<8x1xf32>
    %183 = arith.maximumf %181, %182 : vector<8x1xf32>
    %cst_62 = arith.constant 9.99999974E-6 : f32
    %184 = vector.broadcast %cst_62 : f32 to vector<8x1xf32>
    %185 = arith.addf %183, %184 : vector<8x1xf32>
    %186 = math.rsqrt %185 : vector<8x1xf32>
    %187 = arith.mulf %169, %186 : vector<8x1xf32>
    %188 = arith.mulf %178, %187 : vector<8x1xf32>
    %189 = arith.subf %170, %188 : vector<8x1xf32>
    %190 = vector.broadcast %187 : vector<8x1xf32> to vector<8x256xf32>
    %191 = arith.mulf %171, %190 : vector<8x256xf32>
    %192 = vector.broadcast %189 : vector<8x1xf32> to vector<8x256xf32>
    %193 = arith.addf %191, %192 : vector<8x256xf32>
    %cst_63 = arith.constant 0.000000e+00 : f32
    %194 = vector.broadcast %cst_63 : f32 to vector<8x256xf32>
    %195 = arith.maximumf %193, %194 : vector<8x256xf32>
    %196 = arith.addf %195, %161 : vector<8x256xf32>
    %c1_i32_64 = arith.constant 1 : i32
    %197 = tpu.dynamic_rotate %196 by %c1_i32_64 dim 1 : vector<8x256xf32>, i32 -> vector<8x256xf32>
    %198 = arith.mulf %197, %27 : vector<8x256xf32>
    %c255_i32_65 = arith.constant 255 : i32
    %199 = tpu.dynamic_rotate %196 by %c255_i32_65 dim 1 : vector<8x256xf32>, i32 -> vector<8x256xf32>
    %200 = arith.mulf %199, %40 : vector<8x256xf32>
    %201 = tpu.concatenate %198, %196, %200 in 0 : vector<8x256xf32>, vector<8x256xf32>, vector<8x256xf32> -> vector<24x256xf32>
    %202 = arith.truncf %201 : vector<24x256xf32> to vector<24x256xbf16>
    %c64 = arith.constant 64 : index
    %c0_66 = arith.constant 0 : index
    %203 = vector.load %arg1[%c64, %c0_66] : memref<144x128xbf16, #tpu.memory_space<vmem>>, vector<16x24xbf16>
    %c64_67 = arith.constant 64 : index
    %c0_68 = arith.constant 0 : index
    %204 = vector.load %arg2[%c64_67, %c0_68] : memref<144x2xf32, #tpu.memory_space<vmem>>, vector<16x1xf32>
    %c64_69 = arith.constant 64 : index
    %c1_70 = arith.constant 1 : index
    %205 = vector.load %arg2[%c64_69, %c1_70] : memref<144x2xf32, #tpu.memory_space<vmem>>, vector<16x1xf32>
    %cst_71 = arith.constant dense<0.000000e+00> : vector<16x256xf32>
    %206 = tpu.matmul %203, %202, %cst_71 {dimension_numbers = #tpu.dot_dimension_numbers<[1], [0], [0], [1], [0, 0, 1, 1], [], []>} : vector<16x24xbf16>, vector<24x256xbf16>, vector<16x256xf32> -> vector<16x256xf32>
    %207 = arith.mulf %206, %206 : vector<16x256xf32>
    %208 = tpu.concatenate %206, %207 in 0 : vector<16x256xf32>, vector<16x256xf32> -> vector<32x256xf32>
    %cst_72 = arith.constant dense<0.000000e+00> : vector<32xf32>
    %209 = vector.multi_reduction <add>, %208, %cst_72 [1] : vector<32x256xf32> to vector<32xf32>
    %210 = vector.shape_cast %209 : vector<32xf32> to vector<32x1xf32>
    %cst_73 = arith.constant 3.906250e-03 : f32
    %211 = vector.broadcast %cst_73 : f32 to vector<32x1xf32>
    %212 = arith.mulf %210, %211 : vector<32x1xf32>
    %213 = vector.extract_strided_slice %212 {offsets = [0, 0], sizes = [16, 1], strides = [1, 1]} : vector<32x1xf32> to vector<16x1xf32>
    %214 = vector.extract_strided_slice %212 {offsets = [16, 0], sizes = [16, 1], strides = [1, 1]} : vector<32x1xf32> to vector<16x1xf32>
    %215 = arith.mulf %213, %213 : vector<16x1xf32>
    %216 = arith.subf %214, %215 : vector<16x1xf32>
    %cst_74 = arith.constant 0.000000e+00 : f32
    %217 = vector.broadcast %cst_74 : f32 to vector<16x1xf32>
    %218 = arith.maximumf %216, %217 : vector<16x1xf32>
    %cst_75 = arith.constant 9.99999974E-6 : f32
    %219 = vector.broadcast %cst_75 : f32 to vector<16x1xf32>
    %220 = arith.addf %218, %219 : vector<16x1xf32>
    %221 = math.rsqrt %220 : vector<16x1xf32>
    %222 = arith.mulf %204, %221 : vector<16x1xf32>
    %223 = arith.mulf %213, %222 : vector<16x1xf32>
    %224 = arith.subf %205, %223 : vector<16x1xf32>
    %225 = vector.broadcast %222 : vector<16x1xf32> to vector<16x256xf32>
    %226 = arith.mulf %206, %225 : vector<16x256xf32>
    %227 = vector.broadcast %224 : vector<16x1xf32> to vector<16x256xf32>
    %228 = arith.addf %226, %227 : vector<16x256xf32>
    %cst_76 = arith.constant 0.000000e+00 : f32
    %229 = vector.broadcast %cst_76 : f32 to vector<16x256xf32>
    %230 = arith.maximumf %228, %229 : vector<16x256xf32>
    %231 = vector.extract_strided_slice %230 {offsets = [0, 0], sizes = [8, 256], strides = [1, 1]} : vector<16x256xf32> to vector<8x256xf32>
    %232 = vector.extract_strided_slice %230 {offsets = [8, 0], sizes = [8, 256], strides = [1, 1]} : vector<16x256xf32> to vector<8x256xf32>
    %c1_i32_77 = arith.constant 1 : i32
    %233 = tpu.dynamic_rotate %231 by %c1_i32_77 dim 1 : vector<8x256xf32>, i32 -> vector<8x256xf32>
    %234 = arith.mulf %233, %27 : vector<8x256xf32>
    %c255_i32_78 = arith.constant 255 : i32
    %235 = tpu.dynamic_rotate %231 by %c255_i32_78 dim 1 : vector<8x256xf32>, i32 -> vector<8x256xf32>
    %236 = arith.mulf %235, %40 : vector<8x256xf32>
    %237 = tpu.concatenate %234, %231, %236 in 0 : vector<8x256xf32>, vector<8x256xf32>, vector<8x256xf32> -> vector<24x256xf32>
    %238 = arith.truncf %237 : vector<24x256xf32> to vector<24x256xbf16>
    %c80 = arith.constant 80 : index
    %c0_79 = arith.constant 0 : index
    %239 = vector.load %arg1[%c80, %c0_79] : memref<144x128xbf16, #tpu.memory_space<vmem>>, vector<8x24xbf16>
    %c80_80 = arith.constant 80 : index
    %c0_81 = arith.constant 0 : index
    %240 = vector.load %arg2[%c80_80, %c0_81] : memref<144x2xf32, #tpu.memory_space<vmem>>, vector<8x1xf32>
    %c80_82 = arith.constant 80 : index
    %c1_83 = arith.constant 1 : index
    %241 = vector.load %arg2[%c80_82, %c1_83] : memref<144x2xf32, #tpu.memory_space<vmem>>, vector<8x1xf32>
    %cst_84 = arith.constant dense<0.000000e+00> : vector<8x256xf32>
    %242 = tpu.matmul %239, %238, %cst_84 {dimension_numbers = #tpu.dot_dimension_numbers<[1], [0], [0], [1], [0, 0, 1, 1], [], []>} : vector<8x24xbf16>, vector<24x256xbf16>, vector<8x256xf32> -> vector<8x256xf32>
    %243 = arith.mulf %242, %242 : vector<8x256xf32>
    %244 = tpu.concatenate %242, %243 in 0 : vector<8x256xf32>, vector<8x256xf32> -> vector<16x256xf32>
    %cst_85 = arith.constant dense<0.000000e+00> : vector<16xf32>
    %245 = vector.multi_reduction <add>, %244, %cst_85 [1] : vector<16x256xf32> to vector<16xf32>
    %246 = vector.shape_cast %245 : vector<16xf32> to vector<16x1xf32>
    %cst_86 = arith.constant 3.906250e-03 : f32
    %247 = vector.broadcast %cst_86 : f32 to vector<16x1xf32>
    %248 = arith.mulf %246, %247 : vector<16x1xf32>
    %249 = vector.extract_strided_slice %248 {offsets = [0, 0], sizes = [8, 1], strides = [1, 1]} : vector<16x1xf32> to vector<8x1xf32>
    %250 = vector.extract_strided_slice %248 {offsets = [8, 0], sizes = [8, 1], strides = [1, 1]} : vector<16x1xf32> to vector<8x1xf32>
    %251 = arith.mulf %249, %249 : vector<8x1xf32>
    %252 = arith.subf %250, %251 : vector<8x1xf32>
    %cst_87 = arith.constant 0.000000e+00 : f32
    %253 = vector.broadcast %cst_87 : f32 to vector<8x1xf32>
    %254 = arith.maximumf %252, %253 : vector<8x1xf32>
    %cst_88 = arith.constant 9.99999974E-6 : f32
    %255 = vector.broadcast %cst_88 : f32 to vector<8x1xf32>
    %256 = arith.addf %254, %255 : vector<8x1xf32>
    %257 = math.rsqrt %256 : vector<8x1xf32>
    %258 = arith.mulf %240, %257 : vector<8x1xf32>
    %259 = arith.mulf %249, %258 : vector<8x1xf32>
    %260 = arith.subf %241, %259 : vector<8x1xf32>
    %261 = vector.broadcast %258 : vector<8x1xf32> to vector<8x256xf32>
    %262 = arith.mulf %242, %261 : vector<8x256xf32>
    %263 = vector.broadcast %260 : vector<8x1xf32> to vector<8x256xf32>
    %264 = arith.addf %262, %263 : vector<8x256xf32>
    %cst_89 = arith.constant 0.000000e+00 : f32
    %265 = vector.broadcast %cst_89 : f32 to vector<8x256xf32>
    %266 = arith.maximumf %264, %265 : vector<8x256xf32>
    %267 = arith.addf %266, %232 : vector<8x256xf32>
    %c1_i32_90 = arith.constant 1 : i32
    %268 = tpu.dynamic_rotate %267 by %c1_i32_90 dim 1 : vector<8x256xf32>, i32 -> vector<8x256xf32>
    %269 = arith.mulf %268, %27 : vector<8x256xf32>
    %c255_i32_91 = arith.constant 255 : i32
    %270 = tpu.dynamic_rotate %267 by %c255_i32_91 dim 1 : vector<8x256xf32>, i32 -> vector<8x256xf32>
    %271 = arith.mulf %270, %40 : vector<8x256xf32>
    %272 = tpu.concatenate %269, %267, %271 in 0 : vector<8x256xf32>, vector<8x256xf32>, vector<8x256xf32> -> vector<24x256xf32>
    %273 = arith.truncf %272 : vector<24x256xf32> to vector<24x256xbf16>
    %c96 = arith.constant 96 : index
    %c0_92 = arith.constant 0 : index
    %274 = vector.load %arg1[%c96, %c0_92] : memref<144x128xbf16, #tpu.memory_space<vmem>>, vector<24x24xbf16>
    %c96_93 = arith.constant 96 : index
    %c0_94 = arith.constant 0 : index
    %275 = vector.load %arg2[%c96_93, %c0_94] : memref<144x2xf32, #tpu.memory_space<vmem>>, vector<24x1xf32>
    %c96_95 = arith.constant 96 : index
    %c1_96 = arith.constant 1 : index
    %276 = vector.load %arg2[%c96_95, %c1_96] : memref<144x2xf32, #tpu.memory_space<vmem>>, vector<24x1xf32>
    %cst_97 = arith.constant dense<0.000000e+00> : vector<24x256xf32>
    %277 = tpu.matmul %274, %273, %cst_97 {dimension_numbers = #tpu.dot_dimension_numbers<[1], [0], [0], [1], [0, 0, 1, 1], [], []>} : vector<24x24xbf16>, vector<24x256xbf16>, vector<24x256xf32> -> vector<24x256xf32>
    %278 = arith.mulf %277, %277 : vector<24x256xf32>
    %279 = tpu.concatenate %277, %278 in 0 : vector<24x256xf32>, vector<24x256xf32> -> vector<48x256xf32>
    %cst_98 = arith.constant dense<0.000000e+00> : vector<48xf32>
    %280 = vector.multi_reduction <add>, %279, %cst_98 [1] : vector<48x256xf32> to vector<48xf32>
    %281 = vector.shape_cast %280 : vector<48xf32> to vector<48x1xf32>
    %cst_99 = arith.constant 3.906250e-03 : f32
    %282 = vector.broadcast %cst_99 : f32 to vector<48x1xf32>
    %283 = arith.mulf %281, %282 : vector<48x1xf32>
    %284 = vector.extract_strided_slice %283 {offsets = [0, 0], sizes = [24, 1], strides = [1, 1]} : vector<48x1xf32> to vector<24x1xf32>
    %285 = vector.extract_strided_slice %283 {offsets = [24, 0], sizes = [24, 1], strides = [1, 1]} : vector<48x1xf32> to vector<24x1xf32>
    %286 = arith.mulf %284, %284 : vector<24x1xf32>
    %287 = arith.subf %285, %286 : vector<24x1xf32>
    %cst_100 = arith.constant 0.000000e+00 : f32
    %288 = vector.broadcast %cst_100 : f32 to vector<24x1xf32>
    %289 = arith.maximumf %287, %288 : vector<24x1xf32>
    %cst_101 = arith.constant 9.99999974E-6 : f32
    %290 = vector.broadcast %cst_101 : f32 to vector<24x1xf32>
    %291 = arith.addf %289, %290 : vector<24x1xf32>
    %292 = math.rsqrt %291 : vector<24x1xf32>
    %293 = arith.mulf %275, %292 : vector<24x1xf32>
    %294 = arith.mulf %284, %293 : vector<24x1xf32>
    %295 = arith.subf %276, %294 : vector<24x1xf32>
    %296 = vector.broadcast %293 : vector<24x1xf32> to vector<24x256xf32>
    %297 = arith.mulf %277, %296 : vector<24x256xf32>
    %298 = vector.broadcast %295 : vector<24x1xf32> to vector<24x256xf32>
    %299 = arith.addf %297, %298 : vector<24x256xf32>
    %cst_102 = arith.constant 0.000000e+00 : f32
    %300 = vector.broadcast %cst_102 : f32 to vector<24x256xf32>
    %301 = arith.maximumf %299, %300 : vector<24x256xf32>
    %302 = vector.extract_strided_slice %301 {offsets = [0, 0], sizes = [8, 256], strides = [1, 1]} : vector<24x256xf32> to vector<8x256xf32>
    %303 = vector.extract_strided_slice %301 {offsets = [8, 0], sizes = [16, 256], strides = [1, 1]} : vector<24x256xf32> to vector<16x256xf32>
    %c1_i32_103 = arith.constant 1 : i32
    %304 = tpu.dynamic_rotate %302 by %c1_i32_103 dim 1 : vector<8x256xf32>, i32 -> vector<8x256xf32>
    %305 = arith.mulf %304, %27 : vector<8x256xf32>
    %c255_i32_104 = arith.constant 255 : i32
    %306 = tpu.dynamic_rotate %302 by %c255_i32_104 dim 1 : vector<8x256xf32>, i32 -> vector<8x256xf32>
    %307 = arith.mulf %306, %40 : vector<8x256xf32>
    %308 = tpu.concatenate %305, %302, %307 in 0 : vector<8x256xf32>, vector<8x256xf32>, vector<8x256xf32> -> vector<24x256xf32>
    %309 = arith.truncf %308 : vector<24x256xf32> to vector<24x256xbf16>
    %c128 = arith.constant 128 : index
    %c0_105 = arith.constant 0 : index
    %310 = vector.load %arg1[%c128, %c0_105] : memref<144x128xbf16, #tpu.memory_space<vmem>>, vector<16x24xbf16>
    %c128_106 = arith.constant 128 : index
    %c0_107 = arith.constant 0 : index
    %311 = vector.load %arg2[%c128_106, %c0_107] : memref<144x2xf32, #tpu.memory_space<vmem>>, vector<16x1xf32>
    %c128_108 = arith.constant 128 : index
    %c1_109 = arith.constant 1 : index
    %312 = vector.load %arg2[%c128_108, %c1_109] : memref<144x2xf32, #tpu.memory_space<vmem>>, vector<16x1xf32>
    %cst_110 = arith.constant dense<0.000000e+00> : vector<16x256xf32>
    %313 = tpu.matmul %310, %309, %cst_110 {dimension_numbers = #tpu.dot_dimension_numbers<[1], [0], [0], [1], [0, 0, 1, 1], [], []>} : vector<16x24xbf16>, vector<24x256xbf16>, vector<16x256xf32> -> vector<16x256xf32>
    %314 = arith.mulf %313, %313 : vector<16x256xf32>
    %315 = tpu.concatenate %313, %314 in 0 : vector<16x256xf32>, vector<16x256xf32> -> vector<32x256xf32>
    %cst_111 = arith.constant dense<0.000000e+00> : vector<32xf32>
    %316 = vector.multi_reduction <add>, %315, %cst_111 [1] : vector<32x256xf32> to vector<32xf32>
    %317 = vector.shape_cast %316 : vector<32xf32> to vector<32x1xf32>
    %cst_112 = arith.constant 3.906250e-03 : f32
    %318 = vector.broadcast %cst_112 : f32 to vector<32x1xf32>
    %319 = arith.mulf %317, %318 : vector<32x1xf32>
    %320 = vector.extract_strided_slice %319 {offsets = [0, 0], sizes = [16, 1], strides = [1, 1]} : vector<32x1xf32> to vector<16x1xf32>
    %321 = vector.extract_strided_slice %319 {offsets = [16, 0], sizes = [16, 1], strides = [1, 1]} : vector<32x1xf32> to vector<16x1xf32>
    %322 = arith.mulf %320, %320 : vector<16x1xf32>
    %323 = arith.subf %321, %322 : vector<16x1xf32>
    %cst_113 = arith.constant 0.000000e+00 : f32
    %324 = vector.broadcast %cst_113 : f32 to vector<16x1xf32>
    %325 = arith.maximumf %323, %324 : vector<16x1xf32>
    %cst_114 = arith.constant 9.99999974E-6 : f32
    %326 = vector.broadcast %cst_114 : f32 to vector<16x1xf32>
    %327 = arith.addf %325, %326 : vector<16x1xf32>
    %328 = math.rsqrt %327 : vector<16x1xf32>
    %329 = arith.mulf %311, %328 : vector<16x1xf32>
    %330 = arith.mulf %320, %329 : vector<16x1xf32>
    %331 = arith.subf %312, %330 : vector<16x1xf32>
    %332 = vector.broadcast %329 : vector<16x1xf32> to vector<16x256xf32>
    %333 = arith.mulf %313, %332 : vector<16x256xf32>
    %334 = vector.broadcast %331 : vector<16x1xf32> to vector<16x256xf32>
    %335 = arith.addf %333, %334 : vector<16x256xf32>
    %cst_115 = arith.constant 0.000000e+00 : f32
    %336 = vector.broadcast %cst_115 : f32 to vector<16x256xf32>
    %337 = arith.maximumf %335, %336 : vector<16x256xf32>
    %338 = arith.addf %337, %303 : vector<16x256xf32>
    %339 = vector.extract_strided_slice %338 {offsets = [0, 0], sizes = [16, 128], strides = [1, 1]} : vector<16x256xf32> to vector<16x128xf32>
    %cst_116 = arith.constant dense<0.000000e+00> : vector<16xf32>
    %340 = vector.multi_reduction <add>, %339, %cst_116 [1] : vector<16x128xf32> to vector<16xf32>
    %341 = vector.shape_cast %340 : vector<16xf32> to vector<16x1xf32>
    %342 = vector.extract_strided_slice %338 {offsets = [0, 128], sizes = [16, 128], strides = [1, 1]} : vector<16x256xf32> to vector<16x128xf32>
    %cst_117 = arith.constant dense<0.000000e+00> : vector<16xf32>
    %343 = vector.multi_reduction <add>, %342, %cst_117 [1] : vector<16x128xf32> to vector<16xf32>
    %344 = vector.shape_cast %343 : vector<16xf32> to vector<16x1xf32>
    %345 = tpu.concatenate %341, %344 in 1 : vector<16x1xf32>, vector<16x1xf32> -> vector<16x2xf32>
    %cst_118 = arith.constant 7.812500e-03 : f32
    %346 = vector.broadcast %cst_118 : f32 to vector<16x2xf32>
    %347 = arith.mulf %345, %346 : vector<16x2xf32>
    %348 = arith.mulf %347, %347 : vector<16x2xf32>
    %cst_119 = arith.constant dense<0.000000e+00> : vector<2xf32>
    %349 = vector.multi_reduction <add>, %348, %cst_119 [0] : vector<16x2xf32> to vector<2xf32>
    %350 = vector.shape_cast %349 : vector<2xf32> to vector<1x2xf32>
    %351 = math.sqrt %350 : vector<1x2xf32>
    %cst_120 = arith.constant 9.99999996E-13 : f32
    %352 = vector.broadcast %cst_120 : f32 to vector<1x2xf32>
    %353 = arith.maximumf %351, %352 : vector<1x2xf32>
    %354 = vector.broadcast %353 : vector<1x2xf32> to vector<16x2xf32>
    %355 = arith.divf %347, %354 : vector<16x2xf32>
    %c0_121 = arith.constant 0 : index
    %c0_122 = arith.constant 0 : index
    %356 = vector.load %arg3[%c0_121, %c0_122] : memref<16x2xf32, #tpu.memory_space<vmem>>, vector<16x2xf32>
    tpu.vector_store %arg3[%c0_121, %c0_122], %355 {strides = array<i32>} : memref<16x2xf32, #tpu.memory_space<vmem>>, vector<16x2xf32>,
    return
  }
}

</mosaic_0001>

<bundles_post_ra>
// kernel: tpu_custom_call.1
= control target key start
LH: loop header
LB: loop body
LE: loop exit
PB: predicated region body
PF: predicated region fallthrough
CT: control target
= control target key end

     0   :  { %s1392_s14 = smov 127   ;;  %s1393_s15 = smov 126   ;;  %v1394_v2 = vmov 0   ;;  %v21_v3 = vlaneseq  ;;  %v1397_v9 = vmov 0.0   ;;  %vm98_vm5 = vcmask 1043456   ;;  %s1834_s0 = inlined_call_operand.vmem [shape: f32[8,256], index: 0, kind: input, shape index: {}]   ;;  %s1835_s1 = inlined_call_operand.vmem [shape: bf16[144,128], index: 1, kind: input, shape index: {}]   ;;  %s1836_s2 = inlined_call_operand.vmem [shape: f32[144,2], index: 2, kind: input, shape index: {}]   ;;  %s1837_s3 = inlined_call_operand.vmem [shape: f32[16,2], index: 3, kind: output, shape index: {}]  }
   0x1   :  { %v1422_v0 = vld [vmem:[%s1834_s0] sm:$0xff]  ;;  %v16_v1 = vld [vmem:[%s1834_s0 + $0x8] sm:$0xff]  ;;  %137 = vmatprep.mubr.bf16.mxu0 %v1394_v2  ;;  %1341 = vset.pattern.permute.xlu1 %v1394_v2  ;;  %s1395_s18 = smov 2   ;;  %s1396_s19 = smov 1   ;;  %vm94_vm9 = vcmask 326656   ;;  %v1398_v60 = vmov 1  }
   0x2   :  { %49 = vrot.lane.b32.xlu1 %v1422_v0, %s1392_s14  ;;  %64 = vrot.lane.b32.xlu0 %v1422_v0, %s1393_s15  ;;  %v1442_v4 = vand.u32 127, %v21_v3  ;;  %v1354_v45 = vld [vmem:[%s1835_s1] sm:$0xff]   ;;  %vm383_vm10 = vcmask 195584   ;;  %vm1273_vm11 = vcmask 7168   ;;  %vm1280_vm12 = vcmask 15360  }
   0x3   :  { %305 = vmatprep.mubr.bf16.mxu1 %v1394_v2  ;;  %1342 = vset.pattern.permute.xlu0 %v1398_v60  ;;  %v87_v61 = vld [vmem:[%s1836_s2] sm:$0xff] }
   0x4   :  { %v56_v5 = vadd.s32 1, %v1442_v4  ;;  %v71_v6 = vadd.s32 2, %v1442_v4  ;;  %vm53_vm2 = vcmp.lt.s32.totalorder %v1442_v4, 127  ;;  %vm68_vm3 = vcmp.lt.s32.totalorder %v1442_v4, 126 }
   0x5   :  { %v26_v14 = vadd.s32 4294967294, %v1442_v4  ;;  %v41_v15 = vadd.s32 4294967295, %v1442_v4  ;;  %vm23_vm4 = vcmp.lt.s32.totalorder %v1442_v4, 2  ;;  %vm38_vm8 = vcmp.lt.s32.totalorder %v1442_v4, 1 }
   0x6   :  { %51 = vrot.lane.b32.xlu1 %v16_v1, %s1392_s14  ;;  %66 = vrot.lane.b32.xlu0 %v16_v1, %s1393_s15  ;;  %vm58_vm0 = vcmp.lt.s32.totalorder %v56_v5, 128  ;;  %vm73_vm1 = vcmp.lt.s32.totalorder %v71_v6, 128 }
   0x7   :  { %v1448_v10 = vsel %vm58_vm0, 1.0, %v1397_v9  ;;  %v1450_v11 = vsel %vm73_vm1, 1.0, %v1397_v9  ;;  %vm27_vm6 = vcmp.ge.s32.totalorder %v26_v14, 0  ;;  %vm42_vm7 = vcmp.ge.s32.totalorder %v41_v15, 0 }
   0x8   :  { %v1470_v30 = vsel %vm27_vm6, 1.0, %v1397_v9  ;;  %v1476_v33 = vsel %vm42_vm7, 1.0, %v1397_v9 }
   0xa   :  { %19 = vrot.lane.b32.xlu1 %v16_v1, %s1395_s18  ;;  %17 = vrot.lane.b32.xlu0 %v1422_v0, %s1395_s18 }
   0xe   :  { %36 = vrot.lane.b32.xlu1 %v16_v1, %s1396_s19  ;;  %34 = vrot.lane.b32.xlu0 %v1422_v0, %s1396_s19 }
  0x74   :  { %v50_v7 = vpop.permute.xlu1 %49  ;;  %v65_v8 = vpop.permute.xlu0 %64 }
  0x78   :  { %v52_v12 = vpop.permute.xlu1 %51  ;;  %v67_v13 = vpop.permute.xlu0 %66 }
  0x79   :  { %v55_v16 = vsel %vm53_vm2, %v52_v12, %v50_v7  ;;  %v69_v17 = vsel %vm68_vm3, %v65_v8, %v67_v13  ;;  %v70_v18 = vsel %vm68_vm3, %v67_v13, %v65_v8  ;;  %v54_v19 = vsel %vm53_vm2, %v50_v7, %v52_v12 }
  0x7a   :  { %v63_v20 = vmul.f32 %v1448_v10, %v55_v16  ;;  %v78_v21 = vmul.f32 %v1450_v11, %v70_v18  ;;  %v77_v22 = vmul.f32 %v1450_v11, %v69_v17  ;;  %v62_v27 = vmul.f32 %v1448_v10, %v54_v19 }
  0x7c   :  { %v20_v23 = vpop.permute.xlu1 %19  ;;  %v18_v24 = vpop.permute.xlu0 %17  ;;  %v84_v25 = vpack.c.bf16 %v78_v21, %v78_v21  ;;  %v83_v26 = vpack.c.bf16 %v77_v22, %v77_v22  ;;  %v82_v29 = vpack.c.bf16 %v63_v20, %v16_v1  ;;  %v81_v38 = vpack.c.bf16 %v62_v27, %v1422_v0 }
  0x7d   :  { %v24_v31 = vsel %vm23_vm4, %v18_v24, %v20_v23  ;;  %v25_v32 = vsel %vm23_vm4, %v20_v23, %v18_v24 }
  0x7e   :  { %1312 = vmatprep.subr.msk.bf16.mxu0 %vm98_vm5, %v84_v25  ;;  %v100_v28 = vsel %vm98_vm5, %v83_v26, 0  ;;  %v32_v39 = vmul.f32 %v1470_v30, %v25_v32  ;;  %v33_v40 = vmul.f32 %v1470_v30, %v24_v31 }
  0x7f   :  { %116 = vmatpush1.bf16.msra.mxu0 %v100_v28 }
  0x80   :  { %v37_v34 = vpop.permute.xlu1 %36  ;;  %117 = vmatprep.subr.bf16.mxu0 %v82_v29  ;;  %v35_v35 = vpop.permute.xlu0 %34 }
  0x81   :  { %v39_v36 = vsel %vm38_vm8, %v35_v35, %v37_v34  ;;  %v40_v37 = vsel %vm38_vm8, %v37_v34, %v35_v35 }
  0x82   :  { %v47_v41 = vmul.f32 %v1476_v33, %v40_v37  ;;  %v48_v42 = vmul.f32 %v1476_v33, %v39_v36 }
  0x83   :  { %118 = vmatpush1.bf16.msra.mxu0 %v81_v38 }
  0x84   :  { %v80_v43 = vpack.c.bf16 %v48_v42, %v33_v40  ;;  %v79_v44 = vpack.c.bf16 %v47_v41, %v32_v39 }
  0x86   :  { %119 = vmatprep.subr.bf16.mxu0 %v80_v43 }
  0x87   :  { %120 = vmatpush1.bf16.msra.mxu0 %v79_v44 }
  0x8a   :  { %1313 = vmatmul.mubr.msk.bf16.vlgmr.msra.gmra.mxu0 %vm94_vm9, %v1354_v45 }
  0x8b   :  { %425 = vmatprep.mubr.bf16.mxu0 %v1394_v2 }
 0x14a   :  { %v139_v46 = vpop.f32.mrf.mxu0 }
 0x14b   :  { %v148_v49 = vmul.f32 %v139_v46, %v139_v46 }
 0x14c   :  { %v141_v47 = vpop.f32.mrf.mxu0 }
 0x14d   :  { %v152_v48 = vadd.f32 %v141_v47, %v139_v46  ;;  %v149_v50 = vmul.f32 %v141_v47, %v141_v47 }
 0x14e   :  { %v1505_v15 = vpop.f32.mrf.mxu0 }
 0x14f   :  { %153 = vadd.xlane.f32.xlu0 %v152_v48  ;;  %v158_v51 = vadd.f32 %v149_v50, %v148_v49  ;;  %v150_v19 = vmul.f32 %v1505_v15, %v1505_v15 }
 0x150   :  { %v1507_v16 = vpop.f32.mrf.mxu0 }
 0x151   :  { %159 = vadd.xlane.f32.xlu1 %v158_v51  ;;  %v155_v17 = vadd.f32 %v1507_v16, %v1505_v15  ;;  %v151_v18 = vmul.f32 %v1507_v16, %v1507_v16 }
 0x153   :  { %v161_v20 = vadd.f32 %v151_v18, %v150_v19 }
 0x1d8   :  { %v154_v52 = vpop.xlane.xlu0 %153 }
 0x1d9   :  { %v164_v53 = vmul.f32 0.00390625, %v154_v52 }
 0x1da   :  { %v160_v54 = vpop.xlane.xlu1 %159 }
 0x1db   :  { %v168_v55 = vmul.f32 %v164_v53, %v164_v53  ;;  %v166_v56 = vmul.f32 0.00390625, %v160_v54 }
 0x1dd   :  { %v170_v57 = vsub.f32 %v166_v56, %v168_v55 }
 0x1df   :  { %v172_v58 = vmax.f32 %v170_v57, 0.0 }
 0x1e1   :  { %v174_v59 = vadd.f32 1e-05, %v172_v58 }
 0x1e3   :  { %1360 = vrsqrt.f32 %v174_v59 }
 0x1f0   :  { %v1361_v62 = vpop.eup %1360 }
 0x1f1   :  { %v178_v63 = vmul.f32 %v1361_v62, %v87_v61 }
 0x1f3   :  { %194 = vperm.xlu1 %1341, %v178_v63   ;;  %v180_v0 = vmul.f32 %v178_v63, %v164_v53  ;;  %v262_v53 = vld [vmem:[%s1835_s1 + $0x8] sm:$0xf] }
 0x1f5   :  { %184 = vrot.lane.b32.xlu0 %v180_v0, %s1396_s19 }
 0x267   :  { %v185_v1 = vpop.permute.xlu0 %184 }
 0x268   :  { %v190_v3 = vsub.f32 %v87_v61, %v185_v1 }
 0x26a   :  { %208 = vperm.xlu0 %1342, %v190_v3  }
 0x26e   :  { %v195_v5 = vpop.permute.xlu1 %194 }
 0x26f   :  { %v202_v6 = vmul.f32 %v195_v5, %v139_v46  ;;  %v203_v8 = vmul.f32 %v195_v5, %v141_v47 }
 0x2e5   :  { %v209_v7 = vpop.permute.xlu0 %208 }
 0x2e6   :  { %v216_v9 = vadd.f32 %v209_v7, %v202_v6  ;;  %v217_v12 = vadd.f32 %v209_v7, %v203_v8 }
 0x2e8   :  { %v220_v13 = vmax.f32 %v216_v9, 0.0  ;;  %v221_v14 = vmax.f32 %v217_v12, 0.0  ;;  %v88_v9 = vld [vmem:[%s1836_s2 + $0x8] sm:$0xff] }
 0x2ea   :  { %240 = vrot.lane.b32.xlu0 %v220_v13, %s1392_s14  ;;  %248 = vrot.lane.b32.xlu1 %v220_v13, %s1393_s15 }
 0x2ee   :  { %224 = vrot.lane.b32.xlu0 %v220_v13, %s1395_s18  ;;  %250 = vrot.lane.b32.xlu1 %v221_v14, %s1393_s15 }
 0x2f2   :  { %232 = vrot.lane.b32.xlu0 %v220_v13, %s1396_s19  ;;  %242 = vrot.lane.b32.xlu1 %v221_v14, %s1392_s14 }
 0x2f6   :  { %226 = vrot.lane.b32.xlu1 %v221_v14, %s1395_s18 }
 0x2fa   :  { %234 = vrot.lane.b32.xlu1 %v221_v14, %s1396_s19 }
 0x311   :  { %156 = vadd.xlane.f32.xlu0 %v155_v17 }
 0x315   :  { %162 = vadd.xlane.f32.xlu0 %v161_v20 }
 0x35c   :  { %v249_v21 = vpop.permute.xlu1 %248  ;;  %v241_v22 = vpop.permute.xlu0 %240 }
 0x360   :  { %v251_v23 = vpop.permute.xlu1 %250  ;;  %v225_v35 = vpop.permute.xlu0 %224 }
 0x361   :  { %v252_v24 = vsel %vm68_vm3, %v249_v21, %v251_v23  ;;  %v253_v25 = vsel %vm68_vm3, %v251_v23, %v249_v21 }
 0x362   :  { %v255_v26 = vmul.f32 %v1450_v11, %v253_v25  ;;  %v254_v27 = vmul.f32 %v1450_v11, %v252_v24  ;;  %v263_v24 = vld [vmem:[%s1836_s2 + $0x10] sm:$0xff] }
 0x364   :  { %v243_v28 = vpop.permute.xlu1 %242  ;;  %v261_v29 = vpack.c.bf16 %v255_v26, %v255_v26  ;;  %v260_v31 = vpack.c.bf16 %v254_v27, %v254_v27  ;;  %v233_v43 = vpop.permute.xlu0 %232 }
 0x365   :  { %v244_v32 = vsel %vm53_vm2, %v241_v22, %v243_v28  ;;  %v245_v34 = vsel %vm53_vm2, %v243_v28, %v241_v22 }
 0x366   :  { %v246_v36 = vmul.f32 %v1448_v10, %v244_v32  ;;  %v247_v37 = vmul.f32 %v1448_v10, %v245_v34  ;;  %1314 = vmatprep.subr.msk.bf16.mxu1 %vm98_vm5, %v261_v29  ;;  %v268_v38 = vsel %vm98_vm5, %v260_v31, 0 }
 0x367   :  { %284 = vmatpush1.bf16.msra.mxu1 %v268_v38 }
 0x368   :  { %v227_v11 = vpop.permute.xlu1 %226  ;;  %v259_v39 = vpack.c.bf16 %v247_v37, %v221_v14  ;;  %v258_v40 = vpack.c.bf16 %v246_v36, %v220_v13 }
 0x369   :  { %v228_v41 = vsel %vm23_vm4, %v225_v35, %v227_v11  ;;  %v229_v42 = vsel %vm23_vm4, %v227_v11, %v225_v35 }
 0x36a   :  { %285 = vmatprep.subr.bf16.mxu1 %v259_v39  ;;  %v230_v47 = vmul.f32 %v1470_v30, %v229_v42  ;;  %v231_v48 = vmul.f32 %v1470_v30, %v228_v41 }
 0x36b   :  { %286 = vmatpush1.bf16.msra.mxu1 %v258_v40 }
 0x36c   :  { %v235_v44 = vpop.permute.xlu1 %234 }
 0x36d   :  { %v236_v45 = vsel %vm38_vm8, %v233_v43, %v235_v44  ;;  %v237_v46 = vsel %vm38_vm8, %v235_v44, %v233_v43 }
 0x36e   :  { %v238_v49 = vmul.f32 %v1476_v33, %v237_v46  ;;  %v239_v50 = vmul.f32 %v1476_v33, %v236_v45 }
 0x370   :  { %v257_v51 = vpack.c.bf16 %v239_v50, %v231_v48  ;;  %v256_v52 = vpack.c.bf16 %v238_v49, %v230_v47 }
 0x372   :  { %287 = vmatprep.subr.bf16.mxu1 %v257_v51 }
 0x373   :  { %288 = vmatpush1.bf16.msra.mxu1 %v256_v52 }
 0x376   :  { %1315 = vmatmul.mubr.msk.bf16.vlgmr.msra.gmra.mxu1 %vm94_vm9, %v262_v53 }
 0x377   :  { %575 = vmatprep.mubr.bf16.mxu1 %v1394_v2 }
 0x39a   :  { %v157_v54 = vpop.xlane.xlu0 %156 }
 0x39b   :  { %v165_v56 = vmul.f32 0.00390625, %v157_v54 }
 0x39d   :  { %v169_v57 = vmul.f32 %v165_v56, %v165_v56 }
 0x39e   :  { %v163_v55 = vpop.xlane.xlu0 %162 }
 0x39f   :  { %v167_v30 = vmul.f32 0.00390625, %v163_v55 }
 0x3a1   :  { %v171_v58 = vsub.f32 %v167_v30, %v169_v57 }
 0x3a3   :  { %v173_v59 = vmax.f32 %v171_v58, 0.0 }
 0x3a5   :  { %v175_v61 = vadd.f32 1e-05, %v173_v59 }
 0x3a7   :  { %1362 = vrsqrt.f32 %v175_v61 }
 0x3b4   :  { %v1363_v8 = vpop.eup %1362 }
 0x3b5   :  { %v179_v12 = vmul.f32 %v1363_v8, %v88_v9 }
 0x3b7   :  { %v181_v13 = vmul.f32 %v179_v12, %v165_v56 }
 0x436   :  { %v307_v62 = vpop.f32.mrf.mxu1 }
 0x437   :  { %v314_v1 = vmul.f32 %v307_v62, %v307_v62 }
 0x438   :  { %v309_v63 = vpop.f32.mrf.mxu1 }
 0x439   :  { %v316_v0 = vadd.f32 %v309_v63, %v307_v62  ;;  %v315_v3 = vmul.f32 %v309_v63, %v309_v63 }
 0x43a   :  { %v311_v5 = vpop.f32.mrf.mxu1 }
 0x43b   :  { %317 = vadd.xlane.f32.xlu1 %v316_v0  ;;  %v319_v6 = vadd.f32 %v315_v3, %v314_v1  ;;  %v1355_v3 = vld [vmem:[%s1835_s1 + $0x10] sm:$0xff]  }
 0x43c   :  { %v312_v7 = vpop.f32.mrf.mxu1 }
 0x43d   :  { %320 = vadd.xlane.f32.xlu0 %v319_v6 }
 0x44c   :  { %186 = vrot.lane.b32.xlu1 %v181_v13, %s1396_s19 }
 0x450   :  { %199 = vperm.xlu1 %1341, %v179_v12  }
 0x4c4   :  { %v318_v14 = vpop.xlane.xlu1 %317 }
 0x4c5   :  { %v322_v17 = vmul.f32 0.00390625, %v318_v14 }
 0x4c6   :  { %v321_v18 = vpop.xlane.xlu0 %320 }
 0x4c7   :  { %v324_v19 = vmul.f32 %v322_v17, %v322_v17  ;;  %v323_v20 = vmul.f32 0.00390625, %v321_v18 }
 0x4c8   :  { %v187_v28 = vpop.permute.xlu1 %186 }
 0x4c9   :  { %v325_v21 = vsub.f32 %v323_v20, %v324_v19  ;;  %v191_v29 = vsub.f32 %v88_v9, %v187_v28 }
 0x4cb   :  { %v326_v22 = vmax.f32 %v325_v21, 0.0 }
 0x4cc   :  { %v200_v34 = vpop.permute.xlu1 %199 }
 0x4cd   :  { %v327_v23 = vadd.f32 1e-05, %v326_v22  ;;  %v204_v37 = vmul.f32 %v200_v34, %v1505_v15  ;;  %v205_v38 = vmul.f32 %v200_v34, %v1507_v16 }
 0x4cf   :  { %1364 = vrsqrt.f32 %v327_v23  ;;  %v376_v23 = vld [vmem:[%s1836_s2 + $0x20] sm:$0xff] }
 0x4dc   :  { %v1365_v25 = vpop.eup %1364 }
 0x4dd   :  { %v329_v26 = vmul.f32 %v1365_v25, %v263_v24 }
 0x4df   :  { %338 = vperm.xlu1 %1341, %v329_v26   ;;  %v330_v27 = vmul.f32 %v329_v26, %v322_v17 }
 0x4e1   :  { %332 = vrot.lane.b32.xlu0 %v330_v27, %s1396_s19 }
 0x4e3   :  { %1343 = vset.pattern.permute.xlu1 %v1398_v60 }
 0x4e5   :  { %213 = vperm.xlu0 %1342, %v191_v29  }
 0x553   :  { %v333_v31 = vpop.permute.xlu0 %332 }
 0x554   :  { %v335_v32 = vsub.f32 %v263_v24, %v333_v31 }
 0x556   :  { %345 = vperm.xlu1 %1343, %v335_v32  }
 0x55a   :  { %1344 = vset.pattern.permute.xlu1 %v1394_v2  ;;  %v339_v35 = vpop.permute.xlu1 %338 }
 0x55b   :  { %v341_v11 = vmul.f32 %v339_v35, %v307_v62  ;;  %v342_v39 = vmul.f32 %v339_v35, %v309_v63 }
 0x560   :  { %v214_v36 = vpop.permute.xlu0 %213 }
 0x561   :  { %v218_v40 = vadd.f32 %v214_v36, %v204_v37  ;;  %v219_v41 = vadd.f32 %v214_v36, %v205_v38 }
 0x563   :  { %v222_v45 = vmax.f32 %v218_v40, 0.0  ;;  %v223_v46 = vmax.f32 %v219_v41, 0.0 }
 0x5d1   :  { %v346_v42 = vpop.permute.xlu1 %345 }
 0x5d2   :  { %v348_v43 = vadd.f32 %v346_v42, %v341_v11  ;;  %v349_v44 = vadd.f32 %v346_v42, %v342_v39 }
 0x5d4   :  { %v350_v47 = vmax.f32 %v348_v43, 0.0  ;;  %v351_v48 = vmax.f32 %v349_v44, 0.0 }
 0x5d6   :  { %v353_v49 = vadd.f32 %v351_v48, %v223_v46  ;;  %v352_v50 = vadd.f32 %v350_v47, %v222_v45 }
 0x5d8   :  { %364 = vrot.lane.b32.xlu1 %v353_v49, %s1392_s14  ;;  %362 = vrot.lane.b32.xlu0 %v352_v50, %s1392_s14 }
 0x5dc   :  { %356 = vrot.lane.b32.xlu1 %v353_v49, %s1396_s19  ;;  %354 = vrot.lane.b32.xlu0 %v352_v50, %s1396_s19 }
 0x64a   :  { %v365_v15 = vpop.permute.xlu1 %364  ;;  %v363_v16 = vpop.permute.xlu0 %362 }
 0x64b   :  { %v366_v51 = vsel %vm53_vm2, %v363_v16, %v365_v15  ;;  %v367_v52 = vsel %vm53_vm2, %v365_v15, %v363_v16 }
 0x64c   :  { %v368_v53 = vmul.f32 %v1448_v10, %v366_v51  ;;  %v369_v54 = vmul.f32 %v1448_v10, %v367_v52 }
 0x64e   :  { %v372_v55 = vpack.c.bf16 %v368_v53, %v368_v53  ;;  %v373_v56 = vpack.c.bf16 %v369_v54, %v369_v54  ;;  %v357_v30 = vpop.permute.xlu1 %356  ;;  %v355_v57 = vpop.permute.xlu0 %354 }
 0x64f   :  { %v358_v58 = vsel %vm38_vm8, %v355_v57, %v357_v30  ;;  %v359_v59 = vsel %vm38_vm8, %v357_v30, %v355_v57 }
 0x650   :  { %v360_v61 = vmul.f32 %v1476_v33, %v359_v59  ;;  %v361_v62 = vmul.f32 %v1476_v33, %v358_v58  ;;  %1317 = vmatprep.subr.msk.bf16.mxu0 %vm98_vm5, %v373_v56  ;;  %v388_v63 = vsel %vm98_vm5, %v372_v55, 0  ;;  %v532_v56 = vld [vmem:[%s1835_s1 + $0x18] sm:$0xf] }
 0x651   :  { %406 = vmatpush1.bf16.msra.mxu0 %v388_v63 }
 0x652   :  { %v370_v0 = vpack.c.bf16 %v352_v50, %v360_v61  ;;  %v371_v1 = vpack.c.bf16 %v353_v49, %v361_v62 }
 0x654   :  { %407 = vmatprep.subr.bf16.mxu0 %v371_v1 }
 0x655   :  { %408 = vmatpush1.bf16.msra.mxu0 %v370_v0 }
 0x658   :  { %1318 = vmatmul.mubr.msk.bf16.vlgmr.msra.gmra.mxu0 %vm383_vm10, %v1355_v3 }
 0x659   :  { %694 = vmatprep.mubr.bf16.mxu0 %v1394_v2 }
 0x718   :  { %v427_v5 = vpop.f32.mrf.mxu0 }
 0x719   :  { %v436_v8 = vmul.f32 %v427_v5, %v427_v5 }
 0x71a   :  { %v429_v6 = vpop.f32.mrf.mxu0 }
 0x71b   :  { %v440_v7 = vadd.f32 %v429_v6, %v427_v5  ;;  %v437_v9 = vmul.f32 %v429_v6, %v429_v6 }
 0x71c   :  { %v1590_v11 = vpop.f32.mrf.mxu0 }
 0x71d   :  { %441 = vadd.xlane.f32.xlu0 %v440_v7  ;;  %v446_v12 = vadd.f32 %v437_v9, %v436_v8  ;;  %v438_v1 = vmul.f32 %v1590_v11, %v1590_v11 }
 0x71e   :  { %v1592_v39 = vpop.f32.mrf.mxu0 }
 0x71f   :  { %447 = vadd.xlane.f32.xlu1 %v446_v12  ;;  %v443_v40 = vadd.f32 %v1592_v39, %v1590_v11  ;;  %v439_v62 = vmul.f32 %v1592_v39, %v1592_v39 }
 0x7a6   :  { %v442_v13 = vpop.xlane.xlu0 %441 }
 0x7a7   :  { %v452_v14 = vmul.f32 0.00390625, %v442_v13 }
 0x7a8   :  { %v448_v17 = vpop.xlane.xlu1 %447 }
 0x7a9   :  { %v456_v18 = vmul.f32 %v452_v14, %v452_v14  ;;  %v454_v19 = vmul.f32 0.00390625, %v448_v17 }
 0x7ab   :  { %v458_v20 = vsub.f32 %v454_v19, %v456_v18 }
 0x7ad   :  { %v460_v21 = vmax.f32 %v458_v20, 0.0 }
 0x7af   :  { %v462_v22 = vadd.f32 1e-05, %v460_v21 }
 0x7b1   :  { %1366 = vrsqrt.f32 %v462_v22 }
 0x7be   :  { %v1367_v24 = vpop.eup %1366 }
 0x7bf   :  { %v466_v25 = vmul.f32 %v1367_v24, %v376_v23 }
 0x7c1   :  { %482 = vperm.xlu1 %1344, %v466_v25   ;;  %v468_v26 = vmul.f32 %v466_v25, %v452_v14 }
 0x7c3   :  { %472 = vrot.lane.b32.xlu0 %v468_v26, %s1396_s19  ;;  %v533_v26 = vld [vmem:[%s1836_s2 + $0x30] sm:$0xff] }
 0x835   :  { %v473_v27 = vpop.permute.xlu0 %472 }
 0x836   :  { %v478_v28 = vsub.f32 %v376_v23, %v473_v27 }
 0x838   :  { %496 = vperm.xlu0 %1342, %v478_v28   ;;  %v377_v28 = vld [vmem:[%s1836_s2 + $0x28] sm:$0xff] }
 0x83c   :  { %1345 = vset.pattern.permute.xlu0 %v1394_v2  ;;  %v483_v29 = vpop.permute.xlu1 %482 }
 0x83d   :  { %v490_v31 = vmul.f32 %v483_v29, %v427_v5  ;;  %v491_v32 = vmul.f32 %v483_v29, %v429_v6  ;;  %v449_v5 = vadd.f32 %v439_v62, %v438_v1 }
 0x8b3   :  { %v497_v34 = vpop.permute.xlu0 %496 }
 0x8b4   :  { %v504_v35 = vadd.f32 %v497_v34, %v490_v31  ;;  %v505_v36 = vadd.f32 %v497_v34, %v491_v32 }
 0x8b6   :  { %v508_v37 = vmax.f32 %v504_v35, 0.0  ;;  %v509_v38 = vmax.f32 %v505_v36, 0.0 }
 0x8b8   :  { %522 = vrot.lane.b32.xlu0 %v509_v38, %s1392_s14  ;;  %520 = vrot.lane.b32.xlu1 %v508_v37, %s1392_s14 }
 0x8bc   :  { %514 = vrot.lane.b32.xlu0 %v509_v38, %s1396_s19  ;;  %512 = vrot.lane.b32.xlu1 %v508_v37, %s1396_s19 }
 0x8e0   :  { %444 = vadd.xlane.f32.xlu1 %v443_v40 }
 0x92a   :  { %v523_v41 = vpop.permute.xlu0 %522  ;;  %v521_v42 = vpop.permute.xlu1 %520 }
 0x92b   :  { %v524_v43 = vsel %vm53_vm2, %v521_v42, %v523_v41  ;;  %v525_v44 = vsel %vm53_vm2, %v523_v41, %v521_v42 }
 0x92c   :  { %v526_v45 = vmul.f32 %v1448_v10, %v524_v43  ;;  %v527_v46 = vmul.f32 %v1448_v10, %v525_v44 }
 0x92e   :  { %v530_v47 = vpack.c.bf16 %v526_v45, %v526_v45  ;;  %v531_v48 = vpack.c.bf16 %v527_v46, %v527_v46  ;;  %v515_v49 = vpop.permute.xlu0 %514  ;;  %v513_v50 = vpop.permute.xlu1 %512 }
 0x92f   :  { %v516_v15 = vsel %vm38_vm8, %v513_v50, %v515_v49  ;;  %v517_v16 = vsel %vm38_vm8, %v515_v49, %v513_v50 }
 0x930   :  { %v518_v51 = vmul.f32 %v1476_v33, %v517_v16  ;;  %v519_v52 = vmul.f32 %v1476_v33, %v516_v15  ;;  %1319 = vmatprep.subr.msk.bf16.mxu1 %vm98_vm5, %v531_v48  ;;  %v538_v53 = vsel %vm98_vm5, %v530_v47, 0 }
 0x931   :  { %556 = vmatpush1.bf16.msra.mxu1 %v538_v53 }
 0x932   :  { %v528_v54 = vpack.c.bf16 %v508_v37, %v518_v51  ;;  %v529_v55 = vpack.c.bf16 %v509_v38, %v519_v52 }
 0x934   :  { %557 = vmatprep.subr.bf16.mxu1 %v529_v55 }
 0x935   :  { %558 = vmatpush1.bf16.msra.mxu1 %v528_v54 }
 0x938   :  { %1320 = vmatmul.mubr.msk.bf16.vlgmr.msra.gmra.mxu1 %vm383_vm10, %v532_v56 }
 0x939   :  { %844 = vmatprep.mubr.bf16.mxu1 %v1394_v2 }
 0x969   :  { %v445_v6 = vpop.xlane.xlu1 %444 }
 0x96a   :  { %v453_v8 = vmul.f32 0.00390625, %v445_v6 }
 0x96c   :  { %v457_v18 = vmul.f32 %v453_v8, %v453_v8 }
 0x9f8   :  { %v577_v30 = vpop.f32.mrf.mxu1 }
 0x9f9   :  { %v584_v59 = vmul.f32 %v577_v30, %v577_v30 }
 0x9fa   :  { %v579_v57 = vpop.f32.mrf.mxu1 }
 0x9fb   :  { %v586_v58 = vadd.f32 %v579_v57, %v577_v30  ;;  %v585_v61 = vmul.f32 %v579_v57, %v579_v57 }
 0x9fc   :  { %v581_v63 = vpop.f32.mrf.mxu1 }
 0x9fd   :  { %587 = vadd.xlane.f32.xlu0 %v586_v58  ;;  %v589_v0 = vadd.f32 %v585_v61, %v584_v59 }
 0x9fe   :  { %v582_v3 = vpop.f32.mrf.mxu1 }
 0x9ff   :  { %590 = vadd.xlane.f32.xlu1 %v589_v0 }
 0xa01   :  { %450 = vadd.xlane.f32.xlu0 %v449_v5 }
 0xa86   :  { %v588_v7 = vpop.xlane.xlu0 %587 }
 0xa87   :  { %v592_v9 = vmul.f32 0.00390625, %v588_v7 }
 0xa88   :  { %v591_v12 = vpop.xlane.xlu1 %590 }
 0xa89   :  { %v594_v13 = vmul.f32 %v592_v9, %v592_v9  ;;  %v593_v14 = vmul.f32 0.00390625, %v591_v12  ;;  %v1356_v12 = vld [vmem:[%s1835_s1 + $0x20] sm:$0xff]  }
 0xa8a   :  { %v451_v17 = vpop.xlane.xlu0 %450 }
 0xa8b   :  { %v595_v19 = vsub.f32 %v593_v14, %v594_v13  ;;  %v455_v20 = vmul.f32 0.00390625, %v451_v17 }
 0xa8d   :  { %v596_v21 = vmax.f32 %v595_v19, 0.0  ;;  %v459_v22 = vsub.f32 %v455_v20, %v457_v18 }
 0xa8f   :  { %v597_v23 = vadd.f32 1e-05, %v596_v21  ;;  %v461_v24 = vmax.f32 %v459_v22, 0.0 }
 0xa91   :  { %1368 = vrsqrt.f32 %v597_v23  ;;  %v463_v25 = vadd.f32 1e-05, %v461_v24 }
 0xa93   :  { %1370 = vrsqrt.f32 %v463_v25 }
 0xa9e   :  { %v1369_v27 = vpop.eup %1368 }
 0xa9f   :  { %v599_v29 = vmul.f32 %v1369_v27, %v533_v26 }
 0xaa0   :  { %v1371_v31 = vpop.eup %1370 }
 0xaa1   :  { %v600_v32 = vmul.f32 %v599_v29, %v592_v9  ;;  %v467_v34 = vmul.f32 %v1371_v31, %v377_v28 }
 0xaa3   :  { %602 = vrot.lane.b32.xlu1 %v600_v32, %s1396_s19  ;;  %v469_v35 = vmul.f32 %v467_v34, %v453_v8 }
 0xaa5   :  { %474 = vrot.lane.b32.xlu0 %v469_v35, %s1396_s19 }
 0xaa7   :  { %487 = vperm.xlu1 %1344, %v467_v34  }
 0xaa9   :  { %608 = vperm.xlu0 %1345, %v599_v29   ;;  %v646_v29 = vld [vmem:[%s1836_s2 + $0x40] sm:$0xff] }
 0xaab   :  { %1346 = vset.pattern.permute.xlu1 %v1398_v60 }
 0xaad   :  { %1348 = vset.pattern.permute.xlu0 %v1398_v60 }
 0xb15   :  { %v603_v38 = vpop.permute.xlu1 %602 }
 0xb16   :  { %v605_v40 = vsub.f32 %v533_v26, %v603_v38 }
 0xb17   :  { %v475_v36 = vpop.permute.xlu0 %474 }
 0xb18   :  { %v479_v37 = vsub.f32 %v377_v28, %v475_v36 }
 0xb1a   :  { %501 = vperm.xlu1 %1346, %v479_v37  }
 0xb1e   :  { %615 = vperm.xlu1 %1346, %v605_v40  }
 0xb22   :  { %1347 = vset.pattern.permute.xlu1 %v1394_v2  ;;  %v488_v41 = vpop.permute.xlu1 %487 }
 0xb23   :  { %v492_v44 = vmul.f32 %v488_v41, %v1590_v11  ;;  %v493_v45 = vmul.f32 %v488_v41, %v1592_v39 }
 0xb24   :  { %v609_v42 = vpop.permute.xlu0 %608 }
 0xb25   :  { %v611_v46 = vmul.f32 %v609_v42, %v577_v30  ;;  %v612_v47 = vmul.f32 %v609_v42, %v579_v57 }
 0xb95   :  { %v502_v43 = vpop.permute.xlu1 %501 }
 0xb96   :  { %v506_v48 = vadd.f32 %v502_v43, %v492_v44  ;;  %v507_v49 = vadd.f32 %v502_v43, %v493_v45 }
 0xb98   :  { %v510_v51 = vmax.f32 %v506_v48, 0.0  ;;  %v511_v52 = vmax.f32 %v507_v49, 0.0 }
 0xb99   :  { %v616_v50 = vpop.permute.xlu1 %615 }
 0xb9a   :  { %v618_v15 = vadd.f32 %v616_v50, %v611_v46  ;;  %v619_v16 = vadd.f32 %v616_v50, %v612_v47 }
 0xb9c   :  { %v620_v53 = vmax.f32 %v618_v15, 0.0  ;;  %v621_v54 = vmax.f32 %v619_v16, 0.0 }
 0xb9e   :  { %v623_v55 = vadd.f32 %v621_v54, %v511_v52  ;;  %v622_v56 = vadd.f32 %v620_v53, %v510_v51 }
 0xba0   :  { %634 = vrot.lane.b32.xlu1 %v623_v55, %s1392_s14  ;;  %632 = vrot.lane.b32.xlu0 %v622_v56, %s1392_s14 }
 0xba4   :  { %626 = vrot.lane.b32.xlu1 %v623_v55, %s1396_s19  ;;  %624 = vrot.lane.b32.xlu0 %v622_v56, %s1396_s19 }
 0xc12   :  { %v635_v11 = vpop.permute.xlu1 %634  ;;  %v633_v39 = vpop.permute.xlu0 %632 }
 0xc13   :  { %v636_v30 = vsel %vm53_vm2, %v633_v39, %v635_v11  ;;  %v637_v57 = vsel %vm53_vm2, %v635_v11, %v633_v39 }
 0xc14   :  { %v638_v58 = vmul.f32 %v1448_v10, %v636_v30  ;;  %v639_v59 = vmul.f32 %v1448_v10, %v637_v57 }
 0xc16   :  { %v642_v61 = vpack.c.bf16 %v638_v58, %v638_v58  ;;  %v643_v62 = vpack.c.bf16 %v639_v59, %v639_v59  ;;  %v627_v63 = vpop.permute.xlu1 %626  ;;  %v625_v0 = vpop.permute.xlu0 %624 }
 0xc17   :  { %v628_v1 = vsel %vm38_vm8, %v625_v0, %v627_v63  ;;  %v629_v3 = vsel %vm38_vm8, %v627_v63, %v625_v0 }
 0xc18   :  { %v630_v5 = vmul.f32 %v1476_v33, %v629_v3  ;;  %v631_v6 = vmul.f32 %v1476_v33, %v628_v1  ;;  %1322 = vmatprep.subr.msk.bf16.mxu0 %vm98_vm5, %v643_v62  ;;  %v657_v7 = vsel %vm98_vm5, %v642_v61, 0  ;;  %v801_v1 = vld [vmem:[%s1835_s1 + $0x28] sm:$0xf] }
 0xc19   :  { %675 = vmatpush1.bf16.msra.mxu0 %v657_v7 }
 0xc1a   :  { %v640_v8 = vpack.c.bf16 %v622_v56, %v630_v5  ;;  %v641_v9 = vpack.c.bf16 %v623_v55, %v631_v6 }
 0xc1c   :  { %676 = vmatprep.subr.bf16.mxu0 %v641_v9 }
 0xc1d   :  { %677 = vmatpush1.bf16.msra.mxu0 %v640_v8 }
 0xc20   :  { %1323 = vmatmul.mubr.msk.bf16.vlgmr.msra.gmra.mxu0 %vm383_vm10, %v1356_v12 }
 0xc21   :  { %971 = vmatprep.mubr.bf16.mxu0 %v1394_v2 }
 0xce0   :  { %v696_v13 = vpop.f32.mrf.mxu0 }
 0xce1   :  { %v705_v18 = vmul.f32 %v696_v13, %v696_v13 }
 0xce2   :  { %v698_v14 = vpop.f32.mrf.mxu0 }
 0xce3   :  { %v709_v17 = vadd.f32 %v698_v14, %v696_v13  ;;  %v706_v19 = vmul.f32 %v698_v14, %v698_v14 }
 0xce4   :  { %v1663_v46 = vpop.f32.mrf.mxu0 }
 0xce5   :  { %710 = vadd.xlane.f32.xlu0 %v709_v17  ;;  %v715_v20 = vadd.f32 %v706_v19, %v705_v18  ;;  %v707_v50 = vmul.f32 %v1663_v46, %v1663_v46 }
 0xce6   :  { %v1665_v47 = vpop.f32.mrf.mxu0 }
 0xce7   :  { %716 = vadd.xlane.f32.xlu1 %v715_v20  ;;  %v712_v48 = vadd.f32 %v1665_v47, %v1663_v46  ;;  %v708_v49 = vmul.f32 %v1665_v47, %v1665_v47 }
 0xce9   :  { %v718_v15 = vadd.f32 %v708_v49, %v707_v50 }
 0xd6e   :  { %v711_v21 = vpop.xlane.xlu0 %710 }
 0xd6f   :  { %v721_v22 = vmul.f32 0.00390625, %v711_v21 }
 0xd70   :  { %v717_v23 = vpop.xlane.xlu1 %716 }
 0xd71   :  { %v725_v24 = vmul.f32 %v721_v22, %v721_v22  ;;  %v723_v25 = vmul.f32 0.00390625, %v717_v23 }
 0xd73   :  { %v727_v26 = vsub.f32 %v723_v25, %v725_v24  ;;  %v647_v25 = vld [vmem:[%s1836_s2 + $0x48] sm:$0xff] }
 0xd75   :  { %v729_v27 = vmax.f32 %v727_v26, 0.0 }
 0xd77   :  { %v731_v28 = vadd.f32 1e-05, %v729_v27 }
 0xd79   :  { %1372 = vrsqrt.f32 %v731_v28 }
 0xd86   :  { %v1373_v31 = vpop.eup %1372 }
 0xd87   :  { %v735_v32 = vmul.f32 %v1373_v31, %v646_v29 }
 0xd89   :  { %751 = vperm.xlu1 %1347, %v735_v32   ;;  %v737_v34 = vmul.f32 %v735_v32, %v721_v22 }
 0xd8b   :  { %741 = vrot.lane.b32.xlu0 %v737_v34, %s1396_s19 }
 0xdfd   :  { %v742_v35 = vpop.permute.xlu0 %741 }
 0xdfe   :  { %v747_v36 = vsub.f32 %v646_v29, %v742_v35 }
 0xe00   :  { %765 = vperm.xlu0 %1348, %v747_v36  }
 0xe04   :  { %v752_v37 = vpop.permute.xlu1 %751 }
 0xe05   :  { %v759_v38 = vmul.f32 %v752_v37, %v696_v13  ;;  %v760_v41 = vmul.f32 %v752_v37, %v698_v14 }
 0xe7b   :  { %v766_v40 = vpop.permute.xlu0 %765 }
 0xe7c   :  { %v773_v42 = vadd.f32 %v766_v40, %v759_v38  ;;  %v774_v43 = vadd.f32 %v766_v40, %v760_v41  ;;  %v802_v38 = vld [vmem:[%s1836_s2 + $0x50] sm:$0xff] }
 0xe7e   :  { %v777_v44 = vmax.f32 %v773_v42, 0.0  ;;  %v778_v45 = vmax.f32 %v774_v43, 0.0 }
 0xe80   :  { %781 = vrot.lane.b32.xlu0 %v777_v44, %s1396_s19  ;;  %789 = vrot.lane.b32.xlu1 %v777_v44, %s1392_s14 }
 0xe84   :  { %791 = vrot.lane.b32.xlu1 %v778_v45, %s1392_s14 }
 0xe88   :  { %783 = vrot.lane.b32.xlu1 %v778_v45, %s1396_s19 }
 0xe9f   :  { %713 = vadd.xlane.f32.xlu0 %v712_v48 }
 0xea3   :  { %719 = vadd.xlane.f32.xlu0 %v718_v15 }
 0xef2   :  { %v790_v16 = vpop.permute.xlu1 %789  ;;  %v782_v56 = vpop.permute.xlu0 %781 }
 0xef6   :  { %v792_v51 = vpop.permute.xlu1 %791 }
 0xef7   :  { %v793_v52 = vsel %vm53_vm2, %v790_v16, %v792_v51  ;;  %v794_v53 = vsel %vm53_vm2, %v792_v51, %v790_v16 }
 0xef8   :  { %v795_v54 = vmul.f32 %v1448_v10, %v793_v52  ;;  %v796_v55 = vmul.f32 %v1448_v10, %v794_v53 }
 0xefa   :  { %v799_v11 = vpack.c.bf16 %v795_v54, %v795_v54  ;;  %v800_v39 = vpack.c.bf16 %v796_v55, %v796_v55  ;;  %v784_v30 = vpop.permute.xlu1 %783 }
 0xefb   :  { %v785_v57 = vsel %vm38_vm8, %v782_v56, %v784_v30  ;;  %v786_v58 = vsel %vm38_vm8, %v784_v30, %v782_v56 }
 0xefc   :  { %v787_v59 = vmul.f32 %v1476_v33, %v786_v58  ;;  %v788_v61 = vmul.f32 %v1476_v33, %v785_v57  ;;  %1324 = vmatprep.subr.msk.bf16.mxu1 %vm98_vm5, %v800_v39  ;;  %v807_v62 = vsel %vm98_vm5, %v799_v11, 0 }
 0xefd   :  { %825 = vmatpush1.bf16.msra.mxu1 %v807_v62 }
 0xefe   :  { %v797_v63 = vpack.c.bf16 %v777_v44, %v787_v59  ;;  %v798_v0 = vpack.c.bf16 %v778_v45, %v788_v61 }
 0xf00   :  { %826 = vmatprep.subr.bf16.mxu1 %v798_v0 }
 0xf01   :  { %827 = vmatpush1.bf16.msra.mxu1 %v797_v63 }
 0xf04   :  { %1325 = vmatmul.mubr.msk.bf16.vlgmr.msra.gmra.mxu1 %vm383_vm10, %v801_v1 }
 0xf05   :  { %1174 = vmatprep.mubr.bf16.mxu1 %v1394_v2 }
 0xf28   :  { %v714_v3 = vpop.xlane.xlu0 %713 }
 0xf29   :  { %v722_v6 = vmul.f32 0.00390625, %v714_v3 }
 0xf2b   :  { %v726_v8 = vmul.f32 %v722_v6, %v722_v6 }
 0xf2c   :  { %v720_v5 = vpop.xlane.xlu0 %719 }
 0xf2d   :  { %v724_v7 = vmul.f32 0.00390625, %v720_v5 }
 0xf2f   :  { %v728_v9 = vsub.f32 %v724_v7, %v726_v8 }
 0xf31   :  { %v730_v12 = vmax.f32 %v728_v9, 0.0 }
 0xf33   :  { %v732_v13 = vadd.f32 1e-05, %v730_v12 }
 0xf35   :  { %1374 = vrsqrt.f32 %v732_v13 }
 0xf42   :  { %v1375_v24 = vpop.eup %1374 }
 0xf43   :  { %v736_v26 = vmul.f32 %v1375_v24, %v647_v25 }
 0xf45   :  { %v738_v27 = vmul.f32 %v736_v26, %v722_v6 }
 0xfc4   :  { %v846_v14 = vpop.f32.mrf.mxu1 }
 0xfc5   :  { %v853_v19 = vmul.f32 %v846_v14, %v846_v14 }
 0xfc6   :  { %v848_v17 = vpop.f32.mrf.mxu1 }
 0xfc7   :  { %v855_v18 = vadd.f32 %v848_v17, %v846_v14  ;;  %v854_v20 = vmul.f32 %v848_v17, %v848_v17 }
 0xfc8   :  { %v850_v21 = vpop.f32.mrf.mxu1 }
 0xfc9   :  { %856 = vadd.xlane.f32.xlu1 %v855_v18  ;;  %v858_v22 = vadd.f32 %v854_v20, %v853_v19  ;;  %v1357_v20 = vld [vmem:[%s1835_s1 + $0x30] sm:$0xff]  }
 0xfca   :  { %v851_v23 = vpop.f32.mrf.mxu1 }
 0xfcb   :  { %859 = vadd.xlane.f32.xlu0 %v858_v22 }
 0xfda   :  { %743 = vrot.lane.b32.xlu1 %v738_v27, %s1396_s19  ;;  %v1358_v27 = vld [vmem:[%s1835_s1 + $0x38] ss:$0 sps:$4 sm:$0xff]  }
 0xfde   :  { %756 = vperm.xlu1 %1347, %v736_v26  }
0x1052   :  { %v857_v28 = vpop.xlane.xlu1 %856 }
0x1053   :  { %v861_v29 = vmul.f32 0.00390625, %v857_v28 }
0x1054   :  { %v860_v31 = vpop.xlane.xlu0 %859 }
0x1055   :  { %v863_v32 = vmul.f32 %v861_v29, %v861_v29  ;;  %v862_v34 = vmul.f32 0.00390625, %v860_v31 }
0x1056   :  { %v744_v43 = vpop.permute.xlu1 %743 }
0x1057   :  { %v864_v35 = vsub.f32 %v862_v34, %v863_v32  ;;  %v748_v44 = vsub.f32 %v647_v25, %v744_v43 }
0x1059   :  { %v865_v36 = vmax.f32 %v864_v35, 0.0 }
0x105a   :  { %v757_v49 = vpop.permute.xlu1 %756 }
0x105b   :  { %v866_v37 = vadd.f32 1e-05, %v865_v36  ;;  %v761_v16 = vmul.f32 %v757_v49, %v1663_v46  ;;  %v762_v51 = vmul.f32 %v757_v49, %v1665_v47 }
0x105d   :  { %1376 = vrsqrt.f32 %v866_v37 }
0x106a   :  { %v1377_v40 = vpop.eup %1376 }
0x106b   :  { %v868_v41 = vmul.f32 %v1377_v40, %v802_v38 }
0x106d   :  { %877 = vperm.xlu1 %1347, %v868_v41   ;;  %v869_v42 = vmul.f32 %v868_v41, %v861_v29 }
0x106f   :  { %871 = vrot.lane.b32.xlu0 %v869_v42, %s1396_s19 }
0x1071   :  { %1349 = vset.pattern.permute.xlu1 %v1398_v60 }
0x1073   :  { %770 = vperm.xlu0 %1348, %v748_v44  }
0x10e1   :  { %v872_v45 = vpop.permute.xlu0 %871 }
0x10e2   :  { %v874_v48 = vsub.f32 %v802_v38, %v872_v45  ;;  %v916_v38 = vld [vmem:[%s1836_s2 + $0x60] sm:$0xff] }
0x10e4   :  { %884 = vperm.xlu1 %1349, %v874_v48  }
0x10e8   :  { %1350 = vset.pattern.permute.xlu1 %v1394_v2  ;;  %v878_v50 = vpop.permute.xlu1 %877 }
0x10e9   :  { %v880_v52 = vmul.f32 %v878_v50, %v846_v14  ;;  %v881_v53 = vmul.f32 %v878_v50, %v848_v17 }
0x10ee   :  { %v771_v15 = vpop.permute.xlu0 %770 }
0x10ef   :  { %v775_v54 = vadd.f32 %v771_v15, %v761_v16  ;;  %v776_v55 = vadd.f32 %v771_v15, %v762_v51 }
0x10f1   :  { %v779_v30 = vmax.f32 %v775_v54, 0.0  ;;  %v780_v57 = vmax.f32 %v776_v55, 0.0 }
0x115f   :  { %v885_v56 = vpop.permute.xlu1 %884 }
0x1160   :  { %v887_v11 = vadd.f32 %v885_v56, %v880_v52  ;;  %v888_v39 = vadd.f32 %v885_v56, %v881_v53 }
0x1162   :  { %v889_v58 = vmax.f32 %v887_v11, 0.0  ;;  %v890_v59 = vmax.f32 %v888_v39, 0.0 }
0x1164   :  { %v892_v61 = vadd.f32 %v890_v59, %v780_v57  ;;  %v891_v62 = vadd.f32 %v889_v58, %v779_v30 }
0x1166   :  { %903 = vrot.lane.b32.xlu1 %v892_v61, %s1392_s14  ;;  %901 = vrot.lane.b32.xlu0 %v891_v62, %s1392_s14 }
0x116a   :  { %895 = vrot.lane.b32.xlu1 %v892_v61, %s1396_s19  ;;  %893 = vrot.lane.b32.xlu0 %v891_v62, %s1396_s19 }
0x11d8   :  { %v904_v46 = vpop.permute.xlu1 %903  ;;  %v902_v47 = vpop.permute.xlu0 %901 }
0x11d9   :  { %v905_v63 = vsel %vm53_vm2, %v902_v47, %v904_v46  ;;  %v906_v0 = vsel %vm53_vm2, %v904_v46, %v902_v47 }
0x11da   :  { %v907_v1 = vmul.f32 %v1448_v10, %v905_v63  ;;  %v908_v3 = vmul.f32 %v1448_v10, %v906_v0 }
0x11dc   :  { %v911_v5 = vpack.c.bf16 %v907_v1, %v907_v1  ;;  %v912_v6 = vpack.c.bf16 %v908_v3, %v908_v3  ;;  %v896_v7 = vpop.permute.xlu1 %895  ;;  %v894_v8 = vpop.permute.xlu0 %893 }
0x11dd   :  { %v897_v9 = vsel %vm38_vm8, %v894_v8, %v896_v7  ;;  %v898_v12 = vsel %vm38_vm8, %v896_v7, %v894_v8 }
0x11de   :  { %v899_v13 = vmul.f32 %v1476_v33, %v898_v12  ;;  %v900_v14 = vmul.f32 %v1476_v33, %v897_v9  ;;  %1328 = vmatprep.subr.msk.bf16.mxu0 %vm98_vm5, %v912_v6  ;;  %v934_v17 = vsel %vm98_vm5, %v911_v5, 0 }
0x11df   :  { %952 = vmatpush1.bf16.msra.mxu0 %v934_v17 }
0x11e0   :  { %v909_v18 = vpack.c.bf16 %v891_v62, %v899_v13  ;;  %v910_v19 = vpack.c.bf16 %v892_v61, %v900_v14 }
0x11e2   :  { %953 = vmatprep.subr.bf16.mxu0 %v910_v19 }
0x11e3   :  { %954 = vmatpush1.bf16.msra.mxu0 %v909_v18 }
0x11e6   :  { %1329 = vmatmul.mubr.msk.bf16.vlgmr.msra.gmra.mxu0 %vm383_vm10, %v1357_v20  ;;  %v1359_v20 = vld [vmem:[%s1835_s1 + $0x40] sm:$0xff]  }
0x11e7   :  { %981 = vmatprep.mubr.bf16.mxu0 %v1394_v2 }
0x11ee   :  { %1330 = vmatmul.mubr.msk.bf16.gmra.mxu0 %vm383_vm10, %v1358_v27 }
0x12a6   :  { %v973_v21 = vpop.f32.mrf.mxu0 }
0x12a7   :  { %v990_v24 = vmul.f32 %v973_v21, %v973_v21 }
0x12a8   :  { %v975_v22 = vpop.f32.mrf.mxu0 }
0x12a9   :  { %v996_v23 = vadd.f32 %v975_v22, %v973_v21  ;;  %v991_v25 = vmul.f32 %v975_v22, %v975_v22 }
0x12aa   :  { %v1735_v44 = vpop.f32.mrf.mxu0 }
0x12ab   :  { %997 = vadd.xlane.f32.xlu0 %v996_v23  ;;  %v1005_v26 = vadd.f32 %v991_v25, %v990_v24  ;;  %v992_v57 = vmul.f32 %v1735_v44, %v1735_v44 }
0x12ac   :  { %v1737_v48 = vpop.f32.mrf.mxu0 }
0x12ad   :  { %1006 = vadd.xlane.f32.xlu1 %v1005_v26  ;;  %v993_v30 = vmul.f32 %v1737_v48, %v1737_v48  ;;  %v999_v59 = vadd.f32 %v1737_v48, %v1735_v44 }
0x12ae   :  { %v1739_v49 = vpop.f32.mrf.mxu0 }
0x12af   :  { %v1008_v58 = vadd.f32 %v993_v30, %v992_v57  ;;  %v994_v61 = vmul.f32 %v1739_v49, %v1739_v49 }
0x12b0   :  { %v1742_v50 = vpop.f32.mrf.mxu0 }
0x12b1   :  { %v995_v62 = vmul.f32 %v1742_v50, %v1742_v50 }
0x12b2   :  { %v987_v15 = vpop.f32.mrf.mxu0 }
0x12b3   :  { %v1011_v46 = vadd.f32 %v995_v62, %v994_v61 }
0x12b4   :  { %v988_v16 = vpop.f32.mrf.mxu0 }
0x1334   :  { %v998_v28 = vpop.xlane.xlu0 %997 }
0x1335   :  { %v1014_v29 = vmul.f32 0.00390625, %v998_v28 }
0x1336   :  { %v1007_v31 = vpop.xlane.xlu1 %1006 }
0x1337   :  { %v1020_v32 = vmul.f32 %v1014_v29, %v1014_v29  ;;  %v1017_v34 = vmul.f32 0.00390625, %v1007_v31 }
0x1339   :  { %v1023_v35 = vsub.f32 %v1017_v34, %v1020_v32 }
0x133b   :  { %v1026_v36 = vmax.f32 %v1023_v35, 0.0 }
0x133d   :  { %v1029_v37 = vadd.f32 1e-05, %v1026_v36 }
0x133f   :  { %1378 = vrsqrt.f32 %v1029_v37 }
0x134c   :  { %v1379_v40 = vpop.eup %1378 }
0x134d   :  { %v1035_v41 = vmul.f32 %v1379_v40, %v916_v38 }
0x134f   :  { %1058 = vperm.xlu1 %1350, %v1035_v41   ;;  %v1038_v42 = vmul.f32 %v1035_v41, %v1014_v29 }
0x1351   :  { %1044 = vrot.lane.b32.xlu0 %v1038_v42, %s1396_s19 }
0x13c3   :  { %v1045_v43 = vpop.permute.xlu0 %1044 }
0x13c4   :  { %v1053_v45 = vsub.f32 %v916_v38, %v1045_v43 }
0x13c6   :  { %1079 = vperm.xlu0 %1348, %v1053_v45  }
0x13ca   :  { %1351 = vset.pattern.permute.xlu0 %v1394_v2  ;;  %v1059_v51 = vpop.permute.xlu1 %1058  ;;  %v1002_v2 = vadd.f32 %v1742_v50, %v1739_v49 }
0x13cb   :  { %v1071_v52 = vmul.f32 %v1059_v51, %v973_v21  ;;  %v1072_v53 = vmul.f32 %v1059_v51, %v975_v22 }
0x1441   :  { %v1080_v54 = vpop.permute.xlu0 %1079 }
0x1442   :  { %v1092_v55 = vadd.f32 %v1080_v54, %v1071_v52  ;;  %v1093_v56 = vadd.f32 %v1080_v54, %v1072_v53 }
0x1444   :  { %v1098_v11 = vmax.f32 %v1092_v55, 0.0  ;;  %v1099_v39 = vmax.f32 %v1093_v56, 0.0  ;;  %v918_v55 = vld [vmem:[%s1836_s2 + $0x70] sm:$0xff] }
0x1446   :  { %1114 = vrot.lane.b32.xlu0 %v1099_v39, %s1392_s14  ;;  %1112 = vrot.lane.b32.xlu1 %v1098_v11, %s1392_s14 }
0x144a   :  { %1106 = vrot.lane.b32.xlu0 %v1099_v39, %s1396_s19  ;;  %1104 = vrot.lane.b32.xlu1 %v1098_v11, %s1396_s19 }
0x1469   :  { %1003 = vadd.xlane.f32.xlu0 %v1002_v2 }
0x146d   :  { %1009 = vadd.xlane.f32.xlu0 %v1008_v58 }
0x146e   :  { %1000 = vadd.xlane.f32.xlu1 %v999_v59 }
0x1472   :  { %1012 = vadd.xlane.f32.xlu1 %v1011_v46 }
0x14b8   :  { %v1115_v47 = vpop.permute.xlu0 %1114  ;;  %v1113_v63 = vpop.permute.xlu1 %1112 }
0x14b9   :  { %v1116_v0 = vsel %vm53_vm2, %v1113_v63, %v1115_v47  ;;  %v1117_v1 = vsel %vm53_vm2, %v1115_v47, %v1113_v63 }
0x14ba   :  { %v1118_v3 = vmul.f32 %v1448_v10, %v1116_v0  ;;  %v1119_v5 = vmul.f32 %v1448_v10, %v1117_v1 }
0x14bc   :  { %v1122_v6 = vpack.c.bf16 %v1118_v3, %v1118_v3  ;;  %v1123_v7 = vpack.c.bf16 %v1119_v5, %v1119_v5  ;;  %v1107_v8 = vpop.permute.xlu0 %1106  ;;  %v1105_v9 = vpop.permute.xlu1 %1104 }
0x14bd   :  { %v1108_v12 = vsel %vm38_vm8, %v1105_v9, %v1107_v8  ;;  %v1109_v13 = vsel %vm38_vm8, %v1107_v8, %v1105_v9 }
0x14be   :  { %v1110_v14 = vmul.f32 %v1476_v33, %v1109_v13  ;;  %v1111_v17 = vmul.f32 %v1476_v33, %v1108_v12  ;;  %1332 = vmatprep.subr.msk.bf16.mxu1 %vm98_vm5, %v1123_v7  ;;  %v1137_v18 = vsel %vm98_vm5, %v1122_v6, 0  ;;  %v1126_v13 = vld [vmem:[%s1836_s2 + $0x80] sm:$0xff] }
0x14bf   :  { %1155 = vmatpush1.bf16.msra.mxu1 %v1137_v18  ;;  %v1127_v18 = vld [vmem:[%s1836_s2 + $0x88] sm:$0xff] }
0x14c0   :  { %v1120_v10 = vpack.c.bf16 %v1098_v11, %v1110_v14  ;;  %v1121_v19 = vpack.c.bf16 %v1099_v39, %v1111_v17  ;;  %v917_v11 = vld [vmem:[%s1836_s2 + $0x68] sm:$0xff] }
0x14c2   :  { %1156 = vmatprep.subr.bf16.mxu1 %v1121_v19 }
0x14c3   :  { %1157 = vmatpush1.bf16.msra.mxu1 %v1120_v10 }
0x14c6   :  { %1333 = vmatmul.mubr.msk.bf16.vlgmr.msra.gmra.mxu1 %vm383_vm10, %v1359_v20 }
0x14f2   :  { %v1004_v21 = vpop.xlane.xlu0 %1003 }
0x14f3   :  { %v1016_v22 = vmul.f32 0.00390625, %v1004_v21 }
0x14f5   :  { %v1022_v24 = vmul.f32 %v1016_v22, %v1016_v22 }
0x14f6   :  { %v1010_v26 = vpop.xlane.xlu0 %1009 }
0x14f7   :  { %v1001_v4 = vpop.xlane.xlu1 %1000  ;;  %v1018_v29 = vmul.f32 0.00390625, %v1010_v26 }
0x14f8   :  { %v1015_v33 = vmul.f32 0.00390625, %v1001_v4 }
0x14fa   :  { %v1021_v27 = vmul.f32 %v1015_v33, %v1015_v33 }
0x14fb   :  { %v1013_v23 = vpop.xlane.xlu1 %1012 }
0x14fc   :  { %v1019_v25 = vmul.f32 0.00390625, %v1013_v23  ;;  %v1024_v31 = vsub.f32 %v1018_v29, %v1021_v27 }
0x14fe   :  { %v1025_v28 = vsub.f32 %v1019_v25, %v1022_v24  ;;  %v1027_v35 = vmax.f32 %v1024_v31, 0.0 }
0x1500   :  { %v1028_v32 = vmax.f32 %v1025_v28, 0.0  ;;  %v1030_v42 = vadd.f32 1e-05, %v1027_v35 }
0x1502   :  { %v1031_v37 = vadd.f32 1e-05, %v1028_v32 }
0x1504   :  { %1380 = vrsqrt.f32 %v1031_v37 }
0x1505   :  { %1382 = vrsqrt.f32 %v1030_v42 }
0x1511   :  { %v1381_v54 = vpop.eup %1380 }
0x1512   :  { %v1383_v56 = vpop.eup %1382  ;;  %v1037_v39 = vmul.f32 %v1381_v54, %v918_v55 }
0x1513   :  { %v1036_v2 = vmul.f32 %v1383_v56, %v917_v11 }
0x1514   :  { %v1040_v30 = vmul.f32 %v1037_v39, %v1016_v22 }
0x1515   :  { %v1039_v57 = vmul.f32 %v1036_v2, %v1015_v33 }
0x1586   :  { %v1778_v34 = vpop.f32.mrf.mxu1 }
0x1587   :  { %v1185_v43 = vmul.f32 %v1778_v34, %v1778_v34 }
0x1588   :  { %v1780_v36 = vpop.f32.mrf.mxu1 }
0x1589   :  { %v1189_v38 = vadd.f32 %v1780_v36, %v1778_v34  ;;  %v1186_v40 = vmul.f32 %v1780_v36, %v1780_v36 }
0x158a   :  { %v1786_v41 = vpop.f32.mrf.mxu1 }
0x158b   :  { %1190 = vadd.xlane.f32.xlu0 %v1189_v38  ;;  %v1195_v16 = vadd.f32 %v1186_v40, %v1185_v43  ;;  %v1187_v52 = vmul.f32 %v1786_v41, %v1786_v41 }
0x158c   :  { %v1790_v45 = vpop.f32.mrf.mxu1 }
0x158d   :  { %v1188_v15 = vmul.f32 %v1790_v45, %v1790_v45  ;;  %v1192_v51 = vadd.f32 %v1790_v45, %v1786_v41 }
0x158f   :  { %1196 = vadd.xlane.f32.xlu0 %v1195_v16  ;;  %1193 = vadd.xlane.f32.xlu1 %v1192_v51  ;;  %v1198_v53 = vadd.f32 %v1188_v15, %v1187_v52 }
0x1593   :  { %1199 = vadd.xlane.f32.xlu1 %v1198_v53 }
0x15a4   :  { %1048 = vrot.lane.b32.xlu1 %v1040_v30, %s1396_s19 }
0x15a5   :  { %1046 = vrot.lane.b32.xlu0 %v1039_v57, %s1396_s19 }
0x1614   :  { %v1191_v58 = vpop.xlane.xlu0 %1190 }
0x1615   :  { %v1201_v59 = vmul.f32 0.00390625, %v1191_v58 }
0x1617   :  { %v1205_v46 = vmul.f32 %v1201_v59, %v1201_v59 }
0x1618   :  { %v1197_v61 = vpop.xlane.xlu0 %1196  ;;  %v1194_v62 = vpop.xlane.xlu1 %1193 }
0x1619   :  { %v1203_v47 = vmul.f32 0.00390625, %v1197_v61  ;;  %v1202_v63 = vmul.f32 0.00390625, %v1194_v62 }
0x161b   :  { %v1207_v0 = vsub.f32 %v1203_v47, %v1205_v46  ;;  %v1206_v5 = vmul.f32 %v1202_v63, %v1202_v63 }
0x161c   :  { %v1200_v1 = vpop.xlane.xlu1 %1199  ;;  %v1047_v21 = vpop.permute.xlu0 %1046 }
0x161d   :  { %v1209_v3 = vmax.f32 %v1207_v0, 0.0  ;;  %v1204_v6 = vmul.f32 0.00390625, %v1200_v1  ;;  %v1054_v23 = vsub.f32 %v917_v11, %v1047_v21 }
0x161f   :  { %v1211_v7 = vadd.f32 1e-05, %v1209_v3  ;;  %v1208_v8 = vsub.f32 %v1204_v6, %v1206_v5 }
0x1620   :  { %v1049_v22 = vpop.permute.xlu1 %1048 }
0x1621   :  { %1384 = vrsqrt.f32 %v1211_v7  ;;  %v1210_v9 = vmax.f32 %v1208_v8, 0.0  ;;  %v1055_v33 = vsub.f32 %v918_v55, %v1049_v22 }
0x1623   :  { %v1212_v12 = vadd.f32 1e-05, %v1210_v9 }
0x1625   :  { %1386 = vrsqrt.f32 %v1212_v12 }
0x162e   :  { %v1385_v14 = vpop.eup %1384 }
0x162f   :  { %v1215_v17 = vmul.f32 %v1385_v14, %v1126_v13 }
0x1631   :  { %v1217_v10 = vmul.f32 %v1215_v17, %v1201_v59 }
0x1632   :  { %v1387_v19 = vpop.eup %1386 }
0x1633   :  { %1221 = vrot.lane.b32.xlu1 %v1217_v10, %s1396_s19  ;;  %v1216_v20 = vmul.f32 %v1387_v19, %v1127_v18 }
0x1635   :  { %v1218_v4 = vmul.f32 %v1216_v20, %v1202_v63 }
0x1637   :  { %1063 = vperm.xlu1 %1350, %v1036_v2   ;;  %1223 = vrot.lane.b32.xlu0 %v1218_v4, %s1396_s19 }
0x163b   :  { %1231 = vperm.xlu1 %1350, %v1215_v17   ;;  %1068 = vperm.xlu0 %1351, %v1037_v39  }
0x163f   :  { %1236 = vperm.xlu1 %1350, %v1216_v20   ;;  %1352 = vset.pattern.permute.xlu0 %v1398_v60 }
0x1640   :  { %1084 = vperm.xlu0 %1352, %v1054_v23  }
0x1643   :  { %1353 = vset.pattern.permute.xlu1 %v1398_v60 }
0x1644   :  { %1089 = vperm.xlu1 %1353, %v1055_v33  }
0x16a5   :  { %v1222_v24 = vpop.permute.xlu1 %1221 }
0x16a6   :  { %v1227_v25 = vsub.f32 %v1126_v13, %v1222_v24 }
0x16a8   :  { %1245 = vperm.xlu1 %1353, %v1227_v25  }
0x16a9   :  { %v1224_v26 = vpop.permute.xlu0 %1223 }
0x16aa   :  { %v1228_v27 = vsub.f32 %v1127_v18, %v1224_v26 }
0x16ac   :  { %1250 = vperm.xlu0 %1352, %v1228_v27  }
0x16b2   :  { %v1064_v28 = vpop.permute.xlu1 %1063 }
0x16b3   :  { %v1073_v38 = vmul.f32 %v1064_v28, %v1735_v44  ;;  %v1074_v44 = vmul.f32 %v1064_v28, %v1737_v48 }
0x16b6   :  { %v1232_v29 = vpop.permute.xlu1 %1231  ;;  %v1069_v31 = vpop.permute.xlu0 %1068 }
0x16b7   :  { %v1239_v40 = vmul.f32 %v1232_v29, %v1778_v34  ;;  %v1075_v60 = vmul.f32 %v1069_v31, %v1739_v49  ;;  %v1076_v15 = vmul.f32 %v1069_v31, %v1742_v50  ;;  %v1240_v51 = vmul.f32 %v1232_v29, %v1780_v36 }
0x16ba   :  { %v1237_v32 = vpop.permute.xlu1 %1236 }
0x16bb   :  { %v1085_v35 = vpop.permute.xlu0 %1084  ;;  %v1241_v52 = vmul.f32 %v1237_v32, %v1786_v41  ;;  %v1242_v53 = vmul.f32 %v1237_v32, %v1790_v45 }
0x16bc   :  { %v1094_v42 = vadd.f32 %v1085_v35, %v1073_v38  ;;  %v1095_v57 = vadd.f32 %v1085_v35, %v1074_v44 }
0x16be   :  { %v1100_v54 = vmax.f32 %v1094_v42, 0.0  ;;  %v1101_v62 = vmax.f32 %v1095_v57, 0.0 }
0x16bf   :  { %v1090_v37 = vpop.permute.xlu1 %1089 }
0x16c0   :  { %v1096_v55 = vadd.f32 %v1090_v37, %v1075_v60  ;;  %v1097_v56 = vadd.f32 %v1090_v37, %v1076_v15 }
0x16c2   :  { %v1102_v50 = vmax.f32 %v1096_v55, 0.0  ;;  %v1103_v58 = vmax.f32 %v1097_v56, 0.0 }
0x1723   :  { %v1246_v43 = vpop.permute.xlu1 %1245 }
0x1724   :  { %v1253_v16 = vadd.f32 %v1246_v43, %v1239_v40  ;;  %v1254_v39 = vadd.f32 %v1246_v43, %v1240_v51 }
0x1726   :  { %v1257_v11 = vmax.f32 %v1253_v16, 0.0  ;;  %v1258_v41 = vmax.f32 %v1254_v39, 0.0 }
0x1727   :  { %v1251_v34 = vpop.permute.xlu0 %1250 }
0x1728   :  { %v1255_v2 = vadd.f32 %v1251_v34, %v1241_v52  ;;  %v1256_v30 = vadd.f32 %v1251_v34, %v1242_v53  ;;  %v1261_v49 = vadd.f32 %v1257_v11, %v1100_v54  ;;  %v1262_v46 = vadd.f32 %v1258_v41, %v1101_v62 }
0x172a   :  { %v1259_v59 = vmax.f32 %v1255_v2, 0.0  ;;  %v1260_v36 = vmax.f32 %v1256_v30, 0.0  ;;  %1265 = vadd.xlane.f32.xlu1 %v1261_v49 }
0x172c   :  { %v1263_v61 = vadd.f32 %v1259_v59, %v1102_v50  ;;  %v1264_v45 = vadd.f32 %v1260_v36, %v1103_v58 }
0x172e   :  { %1267 = vadd.xlane.f32.xlu0 %v1263_v61  ;;  %1271 = vadd.xlane.f32.xlu1 %v1264_v45 }
0x1732   :  { %1269 = vadd.xlane.f32.xlu0 %v1262_v46 }
0x17b3   :  { %v1266_v48 = vpop.xlane.xlu1 %1265 }
0x17b7   :  { %v1268_v47 = vpop.xlane.xlu0 %1267  ;;  %v1272_v63 = vpop.xlane.xlu1 %1271 }
0x17b8   :  { %v1275_v0 = vsel %vm1273_vm11, %v1268_v47, %v1272_v63 }
0x17b9   :  { %v1277_v1 = vmul.f32 0.0078125, %v1275_v0 }
0x17bb   :  { %v1270_v3 = vpop.xlane.xlu0 %1269  ;;  %v1279_v6 = vmul.f32 %v1277_v1, %v1277_v1 }
0x17bc   :  { %v1274_v5 = vsel %vm1273_vm11, %v1266_v48, %v1270_v3 }
0x17bd   :  { %v1276_v7 = vmul.f32 0.0078125, %v1274_v5  ;;  %v1282_v9 = vsel %vm1280_vm12, %v1279_v6, 0.0 }
0x17bf   :  { %v1278_v8 = vmul.f32 %v1276_v7, %v1276_v7 }
0x17c1   :  { %v1281_v12 = vsel %vm1280_vm12, %v1278_v8, 0.0 }
0x17c2   :  { %v1283_v13 = vadd.f32 %v1282_v9, %v1281_v12 }
0x17c4   :  { %v1284_v14 = vrot.slane %v1283_v13, 4 }
0x17c6   :  { %v1285_v17 = vadd.f32 %v1284_v14, %v1283_v13 }
0x17c8   :  { %v1286_v18 = vrot.slane %v1285_v17, 2 }
0x17ca   :  { %v1287_v10 = vadd.f32 %v1286_v18, %v1285_v17 }
0x17cc   :  { %v1288_v19 = vrot.slane %v1287_v10, 1 }
0x17ce   :  { %v1289_v20 = vadd.f32 %v1288_v19, %v1287_v10 }
0x17d0   :  { %1388 = vrsqrt.f32 %v1289_v20  ;;  %vm1292_vm13 = vcmp.eq.f32.partialorder %v1289_v20, inf  ;;  %v1295_v22 = vand.u32 2147483648, %v1289_v20  ;;  %vm1294_vm14 = vcmp.eq.f32.partialorder %v1289_v20, 0.0 }
0x17dd   :  { %v1389_v4 = vpop.eup %1388 }
0x17de   :  { %v1291_v21 = vmul.f32 %v1389_v4, %v1289_v20 }
0x17e0   :  { %v1293_v23 = vsel %vm1292_vm13, %v1289_v20, %v1291_v21 }
0x17e1   :  { %v1296_v33 = vsel %vm1294_vm14, %v1295_v22, %v1293_v23 }
0x17e2   :  { %v1297_v24 = vmax.f32 %v1296_v33, 1e-12 }
0x17e4   :  { %1390 = vrcp.f32 %v1297_v24 }
0x17f1   :  { %v1391_v25 = vpop.eup %1390 }
0x17f2   :  { %v1299_v26 = vmul.f32 %v1391_v25, %v1276_v7  ;;  %v1300_v27 = vmul.f32 %v1391_v25, %v1277_v1 }
0x17f4   :  { %1301 = vst.msk [vmem:[%s1837_s3] sm:$0xff] %vm1280_vm12, %v1299_v26  ;;  %1302 = vst.msk [vmem:[%s1837_s3 + $0x8] sm:$0xff] %vm1280_vm12, %v1300_v27 }

</bundles_post_ra>
